<compile_context>
chip_gen: v6e
topology: v6e:2x2x1
jax: 0.10.0
libtpu: 0.0.40
codegen_flags: <defaults>
</compile_context>

<pallas_src>
import jax
import jax.numpy as jnp
import numpy as np
from jax.experimental import pallas as pl
from jax.experimental.pallas import tpu as pltpu

_C1 = 0.01 ** 2
_C2 = 0.03 ** 2


def _ssim_kernel(x_ref, y_ref, o_ref):
    # x_ref / y_ref / o_ref: (nb, H, W) blocks in VMEM.
    nb, H, W = o_ref.shape

    x = x_ref[...].astype(jnp.float32)
    y = y_ref[...].astype(jnp.float32)

    # Boundary masks, built once and shared by all ten separable passes.
    col = jax.lax.broadcasted_iota(jnp.int32, (nb, H, W), 2)
    row = jax.lax.broadcasted_iota(jnp.int32, (nb, H, W), 1)
    first_col = col == 0
    last_col = col == W - 1
    first_row = row == 0
    last_row = row == H - 1

    inv9 = jnp.float32(1.0 / 9.0)

    def tap3_lane(a):
        # 3-tap sum along W with ReflectionPad2d(1) semantics at the borders.
        # Interior: a[j-1] + a[j] + a[j+1]  (rolls; sum is symmetric so the
        # rotation direction is irrelevant).  Borders rebuilt exactly from
        # tiny static slices: j=0 -> a[0] + 2*a[1], j=W-1 -> a[W-1] + 2*a[W-2].
        circ = pltpu.roll(a, 1, axis=2) + a + pltpu.roll(a, W - 1, axis=2)
        fix_lo = a[:, :, 0:1] + 2.0 * a[:, :, 1:2]
        fix_hi = a[:, :, W - 1:W] + 2.0 * a[:, :, W - 2:W - 1]
        return jnp.where(first_col, fix_lo, jnp.where(last_col, fix_hi, circ))

    def tap3_sub(a):
        # Same along H (sublane axis).
        circ = pltpu.roll(a, 1, axis=1) + a + pltpu.roll(a, H - 1, axis=1)
        fix_lo = a[:, 0:1, :] + 2.0 * a[:, 1:2, :]
        fix_hi = a[:, H - 1:H, :] + 2.0 * a[:, H - 2:H - 1, :]
        return jnp.where(first_row, fix_lo, jnp.where(last_row, fix_hi, circ))

    def pool3x3(a):
        # Separable 3x3 average pool (stride 1) with reflection padding.
        return tap3_sub(tap3_lane(a)) * inv9

    # Products CSE'd before shifting; each pooled map finishes both passes
    # before the next one starts (keeps the live working set small).
    mu_x = pool3x3(x)
    mu_y = pool3x3(y)
    e_xx = pool3x3(x * x)
    e_yy = pool3x3(y * y)
    e_xy = pool3x3(x * y)

    mu_x2 = mu_x * mu_x
    mu_y2 = mu_y * mu_y
    mu_xy = mu_x * mu_y

    sigma_x = e_xx - mu_x2
    sigma_y = e_yy - mu_y2
    sigma_xy = e_xy - mu_xy

    ssim_n = (2.0 * mu_xy + _C1) * (2.0 * sigma_xy + _C2)
    ssim_d = (mu_x2 + mu_y2 + _C1) * (sigma_x + sigma_y + _C2)

    # EUP approximate reciprocal + two Newton refinements -> full f32 accuracy
    # (robust to the hardware vrcp error), cheaper than an exact divide on the
    # saturated VALU path.  ssim_d >= C1*C2 > 0, so this is always safe.
    inv_d = pl.reciprocal(ssim_d, approx=True)
    inv_d = inv_d * (2.0 - ssim_d * inv_d)
    inv_d = inv_d * (2.0 - ssim_d * inv_d)

    out = (1.0 - ssim_n * inv_d) * 0.5
    o_ref[...] = jnp.clip(out, 0.0, 1.0).astype(o_ref.dtype)


def _choose_planes_per_step(P, H, W):
    """Number of (B*C) planes processed per grid step.

    Sized so ~14 live full-plane f32 temporaries plus the double-buffered
    input/output blocks stay well inside v7x's 64 MiB VMEM (the smallest of
    v5e/v6e/v7x), while targeting >= 4 grid steps so the 'parallel' grid axis
    keeps both v7x TensorCores busy.  Uses a ceil split; the wrapper pads the
    plane axis if P is not divisible (no nb=1 fallback for awkward P).
    """
    plane_bytes = H * W * 4
    live_factor = 14                    # live full-plane f32 temporaries
    budget = 14 << 20                   # per-step temporary budget
    vmem_cap = max(1, budget // (live_factor * plane_bytes))
    if P >= 4:
        target_steps = 4
    elif P >= 2:
        target_steps = 2
    else:
        target_steps = 1
    nb = -(-P // target_steps)          # ceil
    return int(max(1, min(nb, vmem_cap, 8)))


def _vmem_limit_bytes():
    """~3/4 of physical VMEM (96 MiB on v5e/v6e, 48 MiB on v7x)."""
    try:
        phys = int(pltpu.get_tpu_info().vmem_capacity_bytes)
    except Exception:
        phys = 64 << 20                 # conservative (v7x per-TC) fallback
    return int(min(96 << 20, (phys * 3) // 4))


def ssim_pallas(x, y):
    """SSIM loss map matching PyTorch SSIM.forward. x, y: (B, C, H, W)."""
    assert x.shape == y.shape and x.ndim == 4
    B, C, H, W = x.shape
    assert H >= 2 and W >= 2, "ReflectionPad2d(1) requires H >= 2 and W >= 2"
    P = B * C
    xf = x.reshape(P, H, W)
    yf = y.reshape(P, H, W)

    nb = _choose_planes_per_step(P, H, W)
    steps = -(-P // nb)
    P_pad = steps * nb
    if P_pad != P:
        # Pad the plane axis so every grid step sees a full block (padded
        # planes compute harmless garbage and are sliced off below).
        pad = ((0, P_pad - P), (0, 0), (0, 0))
        xf = jnp.pad(xf, pad)
        yf = jnp.pad(yf, pad)

    out = pl.pallas_call(
        _ssim_kernel,
        out_shape=jax.ShapeDtypeStruct((P_pad, H, W), x.dtype),
        grid=(steps,),
        in_specs=[
            pl.BlockSpec((nb, H, W), lambda i: (i, 0, 0)),
            pl.BlockSpec((nb, H, W), lambda i: (i, 0, 0)),
        ],
        out_specs=pl.BlockSpec((nb, H, W), lambda i: (i, 0, 0)),
        compiler_params=pltpu.CompilerParams(
            dimension_semantics=("parallel",),
            vmem_limit_bytes=_vmem_limit_bytes(),
        ),
    )(xf, yf)

    if P_pad != P:
        out = out[:P]
    return out.reshape(B, C, H, W)


def _ssim_reference(x, y):
    """Pure-JAX reference mirroring the PyTorch module (for verification)."""
    pad = ((0, 0), (0, 0), (1, 1), (1, 1))
    xp = jnp.pad(x, pad, mode="reflect")
    yp = jnp.pad(y, pad, mode="reflect")

    def avgpool3(a):
        return jax.lax.reduce_window(
            a, 0.0, jax.lax.add, (1, 1, 3, 3), (1, 1, 1, 1), "VALID"
        ) / 9.0

    mu_x = avgpool3(xp)
    mu_y = avgpool3(yp)
    sigma_x = avgpool3(xp ** 2) - mu_x ** 2
    sigma_y = avgpool3(yp ** 2) - mu_y ** 2
    sigma_xy = avgpool3(xp * yp) - mu_x * mu_y
    n = (2 * mu_x * mu_y + _C1) * (2 * sigma_xy + _C2)
    d = (mu_x ** 2 + mu_y ** 2 + _C1) * (sigma_x + sigma_y + _C2)
    return jnp.clip((1 - n / d) / 2, 0.0, 1.0)


if __name__ == "__main__":
    key = jax.random.PRNGKey(0)
    kx, ky = jax.random.split(key)
    B, C, H, W = 2, 4, 16, 16
    x = jax.random.uniform(kx, (B, C, H, W), dtype=jnp.float32)
    y = jax.random.uniform(ky, (B, C, H, W), dtype=jnp.float32)

    out = jax.block_until_ready(ssim_pallas(x, y))
    ref = jax.block_until_ready(_ssim_reference(x, y))

    assert out.shape == (B, C, H, W)
    assert np.allclose(np.asarray(out), np.asarray(ref), atol=1e-5, rtol=1e-5)
    print("KERNEL_OK")
</pallas_src>

<mosaic_0001>
module attributes {stable_mosaic.version = 11 : i64} {
  func.func @_ssim_kernel(%arg0: i32, %arg1: memref<2x16x16xf32, #tpu.memory_space<vmem>>, %arg2: memref<2x16x16xf32, #tpu.memory_space<vmem>>, %arg3: memref<2x16x16xf32, #tpu.memory_space<vmem>>) attributes {dimension_semantics = [#tpu.dimension_semantics<parallel>], iteration_bounds = array<i64: 4>, scalar_prefetch = 0 : i64, scratch_operands = 0 : i64, tpu.core_type = #tpu.core_type<tc>, window_params = [{transform_indices = @transform_0, window_bounds = array<i64: 2, 16, 16>}, {transform_indices = @transform_1, window_bounds = array<i64: 2, 16, 16>}, {transform_indices = @transform_2, window_bounds = array<i64: 2, 16, 16>}]} {
    %c0 = arith.constant 0 : index
    %c0_0 = arith.constant 0 : index
    %c0_1 = arith.constant 0 : index
    %0 = vector.load %arg1[%c0, %c0_0, %c0_1] : memref<2x16x16xf32, #tpu.memory_space<vmem>>, vector<2x16x16xf32>
    %c0_2 = arith.constant 0 : index
    %c0_3 = arith.constant 0 : index
    %c0_4 = arith.constant 0 : index
    %1 = vector.load %arg2[%c0_2, %c0_3, %c0_4] : memref<2x16x16xf32, #tpu.memory_space<vmem>>, vector<2x16x16xf32>
    %2 = tpu.iota {dimensions = array<i32: 2>} : vector<2x16x16xi32>
    %3 = tpu.iota {dimensions = array<i32: 1>} : vector<2x16x16xi32>
    %c0_i32 = arith.constant 0 : i32
    %4 = vector.broadcast %c0_i32 : i32 to vector<2x16x16xi32>
    %5 = arith.cmpi eq, %2, %4 : vector<2x16x16xi32>
    %c15_i32 = arith.constant 15 : i32
    %6 = vector.broadcast %c15_i32 : i32 to vector<2x16x16xi32>
    %7 = arith.cmpi eq, %2, %6 : vector<2x16x16xi32>
    %c0_i32_5 = arith.constant 0 : i32
    %8 = vector.broadcast %c0_i32_5 : i32 to vector<2x16x16xi32>
    %9 = arith.cmpi eq, %3, %8 : vector<2x16x16xi32>
    %c15_i32_6 = arith.constant 15 : i32
    %10 = vector.broadcast %c15_i32_6 : i32 to vector<2x16x16xi32>
    %11 = arith.cmpi eq, %3, %10 : vector<2x16x16xi32>
    %c1_i32 = arith.constant 1 : i32
    %12 = tpu.dynamic_rotate %0 by %c1_i32 dim 2 : vector<2x16x16xf32>, i32 -> vector<2x16x16xf32>
    %13 = arith.addf %12, %0 : vector<2x16x16xf32>
    %c15_i32_7 = arith.constant 15 : i32
    %14 = tpu.dynamic_rotate %0 by %c15_i32_7 dim 2 : vector<2x16x16xf32>, i32 -> vector<2x16x16xf32>
    %15 = arith.addf %13, %14 : vector<2x16x16xf32>
    %16 = vector.extract_strided_slice %0 {offsets = [0, 0, 0], sizes = [2, 16, 1], strides = [1, 1, 1]} : vector<2x16x16xf32> to vector<2x16x1xf32>
    %17 = vector.extract_strided_slice %0 {offsets = [0, 0, 1], sizes = [2, 16, 1], strides = [1, 1, 1]} : vector<2x16x16xf32> to vector<2x16x1xf32>
    %cst = arith.constant 2.000000e+00 : f32
    %18 = vector.broadcast %cst : f32 to vector<2x16x1xf32>
    %19 = arith.mulf %18, %17 : vector<2x16x1xf32>
    %20 = arith.addf %16, %19 : vector<2x16x1xf32>
    %21 = vector.extract_strided_slice %0 {offsets = [0, 0, 15], sizes = [2, 16, 1], strides = [1, 1, 1]} : vector<2x16x16xf32> to vector<2x16x1xf32>
    %22 = vector.extract_strided_slice %0 {offsets = [0, 0, 14], sizes = [2, 16, 1], strides = [1, 1, 1]} : vector<2x16x16xf32> to vector<2x16x1xf32>
    %cst_8 = arith.constant 2.000000e+00 : f32
    %23 = vector.broadcast %cst_8 : f32 to vector<2x16x1xf32>
    %24 = arith.mulf %23, %22 : vector<2x16x1xf32>
    %25 = arith.addf %21, %24 : vector<2x16x1xf32>
    %26 = vector.shape_cast %25 : vector<2x16x1xf32> to vector<2x16x1xf32>
    %27 = vector.broadcast %26 : vector<2x16x1xf32> to vector<2x16x16xf32>
    %28 = arith.select %7, %27, %15 : vector<2x16x16xi1>, vector<2x16x16xf32>
    %29 = vector.shape_cast %20 : vector<2x16x1xf32> to vector<2x16x1xf32>
    %30 = vector.broadcast %29 : vector<2x16x1xf32> to vector<2x16x16xf32>
    %31 = arith.select %5, %30, %28 : vector<2x16x16xi1>, vector<2x16x16xf32>
    %c1_i32_9 = arith.constant 1 : i32
    %32 = tpu.dynamic_rotate %31 by %c1_i32_9 dim 1 : vector<2x16x16xf32>, i32 -> vector<2x16x16xf32>
    %33 = arith.addf %32, %31 : vector<2x16x16xf32>
    %c15_i32_10 = arith.constant 15 : i32
    %34 = tpu.dynamic_rotate %31 by %c15_i32_10 dim 1 : vector<2x16x16xf32>, i32 -> vector<2x16x16xf32>
    %35 = arith.addf %33, %34 : vector<2x16x16xf32>
    %36 = vector.extract_strided_slice %31 {offsets = [0, 0, 0], sizes = [2, 1, 16], strides = [1, 1, 1]} : vector<2x16x16xf32> to vector<2x1x16xf32>
    %37 = vector.extract_strided_slice %31 {offsets = [0, 1, 0], sizes = [2, 1, 16], strides = [1, 1, 1]} : vector<2x16x16xf32> to vector<2x1x16xf32>
    %cst_11 = arith.constant 2.000000e+00 : f32
    %38 = vector.broadcast %cst_11 : f32 to vector<2x1x16xf32>
    %39 = arith.mulf %38, %37 : vector<2x1x16xf32>
    %40 = arith.addf %36, %39 : vector<2x1x16xf32>
    %41 = vector.extract_strided_slice %31 {offsets = [0, 15, 0], sizes = [2, 1, 16], strides = [1, 1, 1]} : vector<2x16x16xf32> to vector<2x1x16xf32>
    %42 = vector.extract_strided_slice %31 {offsets = [0, 14, 0], sizes = [2, 1, 16], strides = [1, 1, 1]} : vector<2x16x16xf32> to vector<2x1x16xf32>
    %cst_12 = arith.constant 2.000000e+00 : f32
    %43 = vector.broadcast %cst_12 : f32 to vector<2x1x16xf32>
    %44 = arith.mulf %43, %42 : vector<2x1x16xf32>
    %45 = arith.addf %41, %44 : vector<2x1x16xf32>
    %46 = vector.shape_cast %45 : vector<2x1x16xf32> to vector<2x1x16xf32>
    %47 = vector.broadcast %46 : vector<2x1x16xf32> to vector<2x16x16xf32>
    %48 = arith.select %11, %47, %35 : vector<2x16x16xi1>, vector<2x16x16xf32>
    %49 = vector.shape_cast %40 : vector<2x1x16xf32> to vector<2x1x16xf32>
    %50 = vector.broadcast %49 : vector<2x1x16xf32> to vector<2x16x16xf32>
    %51 = arith.select %9, %50, %48 : vector<2x16x16xi1>, vector<2x16x16xf32>
    %cst_13 = arith.constant 0.111111112 : f32
    %52 = vector.broadcast %cst_13 : f32 to vector<2x16x16xf32>
    %53 = arith.mulf %51, %52 : vector<2x16x16xf32>
    %c1_i32_14 = arith.constant 1 : i32
    %54 = tpu.dynamic_rotate %1 by %c1_i32_14 dim 2 : vector<2x16x16xf32>, i32 -> vector<2x16x16xf32>
    %55 = arith.addf %54, %1 : vector<2x16x16xf32>
    %c15_i32_15 = arith.constant 15 : i32
    %56 = tpu.dynamic_rotate %1 by %c15_i32_15 dim 2 : vector<2x16x16xf32>, i32 -> vector<2x16x16xf32>
    %57 = arith.addf %55, %56 : vector<2x16x16xf32>
    %58 = vector.extract_strided_slice %1 {offsets = [0, 0, 0], sizes = [2, 16, 1], strides = [1, 1, 1]} : vector<2x16x16xf32> to vector<2x16x1xf32>
    %59 = vector.extract_strided_slice %1 {offsets = [0, 0, 1], sizes = [2, 16, 1], strides = [1, 1, 1]} : vector<2x16x16xf32> to vector<2x16x1xf32>
    %cst_16 = arith.constant 2.000000e+00 : f32
    %60 = vector.broadcast %cst_16 : f32 to vector<2x16x1xf32>
    %61 = arith.mulf %60, %59 : vector<2x16x1xf32>
    %62 = arith.addf %58, %61 : vector<2x16x1xf32>
    %63 = vector.extract_strided_slice %1 {offsets = [0, 0, 15], sizes = [2, 16, 1], strides = [1, 1, 1]} : vector<2x16x16xf32> to vector<2x16x1xf32>
    %64 = vector.extract_strided_slice %1 {offsets = [0, 0, 14], sizes = [2, 16, 1], strides = [1, 1, 1]} : vector<2x16x16xf32> to vector<2x16x1xf32>
    %cst_17 = arith.constant 2.000000e+00 : f32
    %65 = vector.broadcast %cst_17 : f32 to vector<2x16x1xf32>
    %66 = arith.mulf %65, %64 : vector<2x16x1xf32>
    %67 = arith.addf %63, %66 : vector<2x16x1xf32>
    %68 = vector.shape_cast %67 : vector<2x16x1xf32> to vector<2x16x1xf32>
    %69 = vector.broadcast %68 : vector<2x16x1xf32> to vector<2x16x16xf32>
    %70 = arith.select %7, %69, %57 : vector<2x16x16xi1>, vector<2x16x16xf32>
    %71 = vector.shape_cast %62 : vector<2x16x1xf32> to vector<2x16x1xf32>
    %72 = vector.broadcast %71 : vector<2x16x1xf32> to vector<2x16x16xf32>
    %73 = arith.select %5, %72, %70 : vector<2x16x16xi1>, vector<2x16x16xf32>
    %c1_i32_18 = arith.constant 1 : i32
    %74 = tpu.dynamic_rotate %73 by %c1_i32_18 dim 1 : vector<2x16x16xf32>, i32 -> vector<2x16x16xf32>
    %75 = arith.addf %74, %73 : vector<2x16x16xf32>
    %c15_i32_19 = arith.constant 15 : i32
    %76 = tpu.dynamic_rotate %73 by %c15_i32_19 dim 1 : vector<2x16x16xf32>, i32 -> vector<2x16x16xf32>
    %77 = arith.addf %75, %76 : vector<2x16x16xf32>
    %78 = vector.extract_strided_slice %73 {offsets = [0, 0, 0], sizes = [2, 1, 16], strides = [1, 1, 1]} : vector<2x16x16xf32> to vector<2x1x16xf32>
    %79 = vector.extract_strided_slice %73 {offsets = [0, 1, 0], sizes = [2, 1, 16], strides = [1, 1, 1]} : vector<2x16x16xf32> to vector<2x1x16xf32>
    %cst_20 = arith.constant 2.000000e+00 : f32
    %80 = vector.broadcast %cst_20 : f32 to vector<2x1x16xf32>
    %81 = arith.mulf %80, %79 : vector<2x1x16xf32>
    %82 = arith.addf %78, %81 : vector<2x1x16xf32>
    %83 = vector.extract_strided_slice %73 {offsets = [0, 15, 0], sizes = [2, 1, 16], strides = [1, 1, 1]} : vector<2x16x16xf32> to vector<2x1x16xf32>
    %84 = vector.extract_strided_slice %73 {offsets = [0, 14, 0], sizes = [2, 1, 16], strides = [1, 1, 1]} : vector<2x16x16xf32> to vector<2x1x16xf32>
    %cst_21 = arith.constant 2.000000e+00 : f32
    %85 = vector.broadcast %cst_21 : f32 to vector<2x1x16xf32>
    %86 = arith.mulf %85, %84 : vector<2x1x16xf32>
    %87 = arith.addf %83, %86 : vector<2x1x16xf32>
    %88 = vector.shape_cast %87 : vector<2x1x16xf32> to vector<2x1x16xf32>
    %89 = vector.broadcast %88 : vector<2x1x16xf32> to vector<2x16x16xf32>
    %90 = arith.select %11, %89, %77 : vector<2x16x16xi1>, vector<2x16x16xf32>
    %91 = vector.shape_cast %82 : vector<2x1x16xf32> to vector<2x1x16xf32>
    %92 = vector.broadcast %91 : vector<2x1x16xf32> to vector<2x16x16xf32>
    %93 = arith.select %9, %92, %90 : vector<2x16x16xi1>, vector<2x16x16xf32>
    %cst_22 = arith.constant 0.111111112 : f32
    %94 = vector.broadcast %cst_22 : f32 to vector<2x16x16xf32>
    %95 = arith.mulf %93, %94 : vector<2x16x16xf32>
    %96 = arith.mulf %0, %0 : vector<2x16x16xf32>
    %c1_i32_23 = arith.constant 1 : i32
    %97 = tpu.dynamic_rotate %96 by %c1_i32_23 dim 2 : vector<2x16x16xf32>, i32 -> vector<2x16x16xf32>
    %98 = arith.addf %97, %96 : vector<2x16x16xf32>
    %c15_i32_24 = arith.constant 15 : i32
    %99 = tpu.dynamic_rotate %96 by %c15_i32_24 dim 2 : vector<2x16x16xf32>, i32 -> vector<2x16x16xf32>
    %100 = arith.addf %98, %99 : vector<2x16x16xf32>
    %101 = vector.extract_strided_slice %96 {offsets = [0, 0, 0], sizes = [2, 16, 1], strides = [1, 1, 1]} : vector<2x16x16xf32> to vector<2x16x1xf32>
    %102 = vector.extract_strided_slice %96 {offsets = [0, 0, 1], sizes = [2, 16, 1], strides = [1, 1, 1]} : vector<2x16x16xf32> to vector<2x16x1xf32>
    %cst_25 = arith.constant 2.000000e+00 : f32
    %103 = vector.broadcast %cst_25 : f32 to vector<2x16x1xf32>
    %104 = arith.mulf %103, %102 : vector<2x16x1xf32>
    %105 = arith.addf %101, %104 : vector<2x16x1xf32>
    %106 = vector.extract_strided_slice %96 {offsets = [0, 0, 15], sizes = [2, 16, 1], strides = [1, 1, 1]} : vector<2x16x16xf32> to vector<2x16x1xf32>
    %107 = vector.extract_strided_slice %96 {offsets = [0, 0, 14], sizes = [2, 16, 1], strides = [1, 1, 1]} : vector<2x16x16xf32> to vector<2x16x1xf32>
    %cst_26 = arith.constant 2.000000e+00 : f32
    %108 = vector.broadcast %cst_26 : f32 to vector<2x16x1xf32>
    %109 = arith.mulf %108, %107 : vector<2x16x1xf32>
    %110 = arith.addf %106, %109 : vector<2x16x1xf32>
    %111 = vector.shape_cast %110 : vector<2x16x1xf32> to vector<2x16x1xf32>
    %112 = vector.broadcast %111 : vector<2x16x1xf32> to vector<2x16x16xf32>
    %113 = arith.select %7, %112, %100 : vector<2x16x16xi1>, vector<2x16x16xf32>
    %114 = vector.shape_cast %105 : vector<2x16x1xf32> to vector<2x16x1xf32>
    %115 = vector.broadcast %114 : vector<2x16x1xf32> to vector<2x16x16xf32>
    %116 = arith.select %5, %115, %113 : vector<2x16x16xi1>, vector<2x16x16xf32>
    %c1_i32_27 = arith.constant 1 : i32
    %117 = tpu.dynamic_rotate %116 by %c1_i32_27 dim 1 : vector<2x16x16xf32>, i32 -> vector<2x16x16xf32>
    %118 = arith.addf %117, %116 : vector<2x16x16xf32>
    %c15_i32_28 = arith.constant 15 : i32
    %119 = tpu.dynamic_rotate %116 by %c15_i32_28 dim 1 : vector<2x16x16xf32>, i32 -> vector<2x16x16xf32>
    %120 = arith.addf %118, %119 : vector<2x16x16xf32>
    %121 = vector.extract_strided_slice %116 {offsets = [0, 0, 0], sizes = [2, 1, 16], strides = [1, 1, 1]} : vector<2x16x16xf32> to vector<2x1x16xf32>
    %122 = vector.extract_strided_slice %116 {offsets = [0, 1, 0], sizes = [2, 1, 16], strides = [1, 1, 1]} : vector<2x16x16xf32> to vector<2x1x16xf32>
    %cst_29 = arith.constant 2.000000e+00 : f32
    %123 = vector.broadcast %cst_29 : f32 to vector<2x1x16xf32>
    %124 = arith.mulf %123, %122 : vector<2x1x16xf32>
    %125 = arith.addf %121, %124 : vector<2x1x16xf32>
    %126 = vector.extract_strided_slice %116 {offsets = [0, 15, 0], sizes = [2, 1, 16], strides = [1, 1, 1]} : vector<2x16x16xf32> to vector<2x1x16xf32>
    %127 = vector.extract_strided_slice %116 {offsets = [0, 14, 0], sizes = [2, 1, 16], strides = [1, 1, 1]} : vector<2x16x16xf32> to vector<2x1x16xf32>
    %cst_30 = arith.constant 2.000000e+00 : f32
    %128 = vector.broadcast %cst_30 : f32 to vector<2x1x16xf32>
    %129 = arith.mulf %128, %127 : vector<2x1x16xf32>
    %130 = arith.addf %126, %129 : vector<2x1x16xf32>
    %131 = vector.shape_cast %130 : vector<2x1x16xf32> to vector<2x1x16xf32>
    %132 = vector.broadcast %131 : vector<2x1x16xf32> to vector<2x16x16xf32>
    %133 = arith.select %11, %132, %120 : vector<2x16x16xi1>, vector<2x16x16xf32>
    %134 = vector.shape_cast %125 : vector<2x1x16xf32> to vector<2x1x16xf32>
    %135 = vector.broadcast %134 : vector<2x1x16xf32> to vector<2x16x16xf32>
    %136 = arith.select %9, %135, %133 : vector<2x16x16xi1>, vector<2x16x16xf32>
    %cst_31 = arith.constant 0.111111112 : f32
    %137 = vector.broadcast %cst_31 : f32 to vector<2x16x16xf32>
    %138 = arith.mulf %136, %137 : vector<2x16x16xf32>
    %139 = arith.mulf %1, %1 : vector<2x16x16xf32>
    %c1_i32_32 = arith.constant 1 : i32
    %140 = tpu.dynamic_rotate %139 by %c1_i32_32 dim 2 : vector<2x16x16xf32>, i32 -> vector<2x16x16xf32>
    %141 = arith.addf %140, %139 : vector<2x16x16xf32>
    %c15_i32_33 = arith.constant 15 : i32
    %142 = tpu.dynamic_rotate %139 by %c15_i32_33 dim 2 : vector<2x16x16xf32>, i32 -> vector<2x16x16xf32>
    %143 = arith.addf %141, %142 : vector<2x16x16xf32>
    %144 = vector.extract_strided_slice %139 {offsets = [0, 0, 0], sizes = [2, 16, 1], strides = [1, 1, 1]} : vector<2x16x16xf32> to vector<2x16x1xf32>
    %145 = vector.extract_strided_slice %139 {offsets = [0, 0, 1], sizes = [2, 16, 1], strides = [1, 1, 1]} : vector<2x16x16xf32> to vector<2x16x1xf32>
    %cst_34 = arith.constant 2.000000e+00 : f32
    %146 = vector.broadcast %cst_34 : f32 to vector<2x16x1xf32>
    %147 = arith.mulf %146, %145 : vector<2x16x1xf32>
    %148 = arith.addf %144, %147 : vector<2x16x1xf32>
    %149 = vector.extract_strided_slice %139 {offsets = [0, 0, 15], sizes = [2, 16, 1], strides = [1, 1, 1]} : vector<2x16x16xf32> to vector<2x16x1xf32>
    %150 = vector.extract_strided_slice %139 {offsets = [0, 0, 14], sizes = [2, 16, 1], strides = [1, 1, 1]} : vector<2x16x16xf32> to vector<2x16x1xf32>
    %cst_35 = arith.constant 2.000000e+00 : f32
    %151 = vector.broadcast %cst_35 : f32 to vector<2x16x1xf32>
    %152 = arith.mulf %151, %150 : vector<2x16x1xf32>
    %153 = arith.addf %149, %152 : vector<2x16x1xf32>
    %154 = vector.shape_cast %153 : vector<2x16x1xf32> to vector<2x16x1xf32>
    %155 = vector.broadcast %154 : vector<2x16x1xf32> to vector<2x16x16xf32>
    %156 = arith.select %7, %155, %143 : vector<2x16x16xi1>, vector<2x16x16xf32>
    %157 = vector.shape_cast %148 : vector<2x16x1xf32> to vector<2x16x1xf32>
    %158 = vector.broadcast %157 : vector<2x16x1xf32> to vector<2x16x16xf32>
    %159 = arith.select %5, %158, %156 : vector<2x16x16xi1>, vector<2x16x16xf32>
    %c1_i32_36 = arith.constant 1 : i32
    %160 = tpu.dynamic_rotate %159 by %c1_i32_36 dim 1 : vector<2x16x16xf32>, i32 -> vector<2x16x16xf32>
    %161 = arith.addf %160, %159 : vector<2x16x16xf32>
    %c15_i32_37 = arith.constant 15 : i32
    %162 = tpu.dynamic_rotate %159 by %c15_i32_37 dim 1 : vector<2x16x16xf32>, i32 -> vector<2x16x16xf32>
    %163 = arith.addf %161, %162 : vector<2x16x16xf32>
    %164 = vector.extract_strided_slice %159 {offsets = [0, 0, 0], sizes = [2, 1, 16], strides = [1, 1, 1]} : vector<2x16x16xf32> to vector<2x1x16xf32>
    %165 = vector.extract_strided_slice %159 {offsets = [0, 1, 0], sizes = [2, 1, 16], strides = [1, 1, 1]} : vector<2x16x16xf32> to vector<2x1x16xf32>
    %cst_38 = arith.constant 2.000000e+00 : f32
    %166 = vector.broadcast %cst_38 : f32 to vector<2x1x16xf32>
    %167 = arith.mulf %166, %165 : vector<2x1x16xf32>
    %168 = arith.addf %164, %167 : vector<2x1x16xf32>
    %169 = vector.extract_strided_slice %159 {offsets = [0, 15, 0], sizes = [2, 1, 16], strides = [1, 1, 1]} : vector<2x16x16xf32> to vector<2x1x16xf32>
    %170 = vector.extract_strided_slice %159 {offsets = [0, 14, 0], sizes = [2, 1, 16], strides = [1, 1, 1]} : vector<2x16x16xf32> to vector<2x1x16xf32>
    %cst_39 = arith.constant 2.000000e+00 : f32
    %171 = vector.broadcast %cst_39 : f32 to vector<2x1x16xf32>
    %172 = arith.mulf %171, %170 : vector<2x1x16xf32>
    %173 = arith.addf %169, %172 : vector<2x1x16xf32>
    %174 = vector.shape_cast %173 : vector<2x1x16xf32> to vector<2x1x16xf32>
    %175 = vector.broadcast %174 : vector<2x1x16xf32> to vector<2x16x16xf32>
    %176 = arith.select %11, %175, %163 : vector<2x16x16xi1>, vector<2x16x16xf32>
    %177 = vector.shape_cast %168 : vector<2x1x16xf32> to vector<2x1x16xf32>
    %178 = vector.broadcast %177 : vector<2x1x16xf32> to vector<2x16x16xf32>
    %179 = arith.select %9, %178, %176 : vector<2x16x16xi1>, vector<2x16x16xf32>
    %cst_40 = arith.constant 0.111111112 : f32
    %180 = vector.broadcast %cst_40 : f32 to vector<2x16x16xf32>
    %181 = arith.mulf %179, %180 : vector<2x16x16xf32>
    %182 = arith.mulf %0, %1 : vector<2x16x16xf32>
    %c1_i32_41 = arith.constant 1 : i32
    %183 = tpu.dynamic_rotate %182 by %c1_i32_41 dim 2 : vector<2x16x16xf32>, i32 -> vector<2x16x16xf32>
    %184 = arith.addf %183, %182 : vector<2x16x16xf32>
    %c15_i32_42 = arith.constant 15 : i32
    %185 = tpu.dynamic_rotate %182 by %c15_i32_42 dim 2 : vector<2x16x16xf32>, i32 -> vector<2x16x16xf32>
    %186 = arith.addf %184, %185 : vector<2x16x16xf32>
    %187 = vector.extract_strided_slice %182 {offsets = [0, 0, 0], sizes = [2, 16, 1], strides = [1, 1, 1]} : vector<2x16x16xf32> to vector<2x16x1xf32>
    %188 = vector.extract_strided_slice %182 {offsets = [0, 0, 1], sizes = [2, 16, 1], strides = [1, 1, 1]} : vector<2x16x16xf32> to vector<2x16x1xf32>
    %cst_43 = arith.constant 2.000000e+00 : f32
    %189 = vector.broadcast %cst_43 : f32 to vector<2x16x1xf32>
    %190 = arith.mulf %189, %188 : vector<2x16x1xf32>
    %191 = arith.addf %187, %190 : vector<2x16x1xf32>
    %192 = vector.extract_strided_slice %182 {offsets = [0, 0, 15], sizes = [2, 16, 1], strides = [1, 1, 1]} : vector<2x16x16xf32> to vector<2x16x1xf32>
    %193 = vector.extract_strided_slice %182 {offsets = [0, 0, 14], sizes = [2, 16, 1], strides = [1, 1, 1]} : vector<2x16x16xf32> to vector<2x16x1xf32>
    %cst_44 = arith.constant 2.000000e+00 : f32
    %194 = vector.broadcast %cst_44 : f32 to vector<2x16x1xf32>
    %195 = arith.mulf %194, %193 : vector<2x16x1xf32>
    %196 = arith.addf %192, %195 : vector<2x16x1xf32>
    %197 = vector.shape_cast %196 : vector<2x16x1xf32> to vector<2x16x1xf32>
    %198 = vector.broadcast %197 : vector<2x16x1xf32> to vector<2x16x16xf32>
    %199 = arith.select %7, %198, %186 : vector<2x16x16xi1>, vector<2x16x16xf32>
    %200 = vector.shape_cast %191 : vector<2x16x1xf32> to vector<2x16x1xf32>
    %201 = vector.broadcast %200 : vector<2x16x1xf32> to vector<2x16x16xf32>
    %202 = arith.select %5, %201, %199 : vector<2x16x16xi1>, vector<2x16x16xf32>
    %c1_i32_45 = arith.constant 1 : i32
    %203 = tpu.dynamic_rotate %202 by %c1_i32_45 dim 1 : vector<2x16x16xf32>, i32 -> vector<2x16x16xf32>
    %204 = arith.addf %203, %202 : vector<2x16x16xf32>
    %c15_i32_46 = arith.constant 15 : i32
    %205 = tpu.dynamic_rotate %202 by %c15_i32_46 dim 1 : vector<2x16x16xf32>, i32 -> vector<2x16x16xf32>
    %206 = arith.addf %204, %205 : vector<2x16x16xf32>
    %207 = vector.extract_strided_slice %202 {offsets = [0, 0, 0], sizes = [2, 1, 16], strides = [1, 1, 1]} : vector<2x16x16xf32> to vector<2x1x16xf32>
    %208 = vector.extract_strided_slice %202 {offsets = [0, 1, 0], sizes = [2, 1, 16], strides = [1, 1, 1]} : vector<2x16x16xf32> to vector<2x1x16xf32>
    %cst_47 = arith.constant 2.000000e+00 : f32
    %209 = vector.broadcast %cst_47 : f32 to vector<2x1x16xf32>
    %210 = arith.mulf %209, %208 : vector<2x1x16xf32>
    %211 = arith.addf %207, %210 : vector<2x1x16xf32>
    %212 = vector.extract_strided_slice %202 {offsets = [0, 15, 0], sizes = [2, 1, 16], strides = [1, 1, 1]} : vector<2x16x16xf32> to vector<2x1x16xf32>
    %213 = vector.extract_strided_slice %202 {offsets = [0, 14, 0], sizes = [2, 1, 16], strides = [1, 1, 1]} : vector<2x16x16xf32> to vector<2x1x16xf32>
    %cst_48 = arith.constant 2.000000e+00 : f32
    %214 = vector.broadcast %cst_48 : f32 to vector<2x1x16xf32>
    %215 = arith.mulf %214, %213 : vector<2x1x16xf32>
    %216 = arith.addf %212, %215 : vector<2x1x16xf32>
    %217 = vector.shape_cast %216 : vector<2x1x16xf32> to vector<2x1x16xf32>
    %218 = vector.broadcast %217 : vector<2x1x16xf32> to vector<2x16x16xf32>
    %219 = arith.select %11, %218, %206 : vector<2x16x16xi1>, vector<2x16x16xf32>
    %220 = vector.shape_cast %211 : vector<2x1x16xf32> to vector<2x1x16xf32>
    %221 = vector.broadcast %220 : vector<2x1x16xf32> to vector<2x16x16xf32>
    %222 = arith.select %9, %221, %219 : vector<2x16x16xi1>, vector<2x16x16xf32>
    %cst_49 = arith.constant 0.111111112 : f32
    %223 = vector.broadcast %cst_49 : f32 to vector<2x16x16xf32>
    %224 = arith.mulf %222, %223 : vector<2x16x16xf32>
    %225 = arith.mulf %53, %53 : vector<2x16x16xf32>
    %226 = arith.mulf %95, %95 : vector<2x16x16xf32>
    %227 = arith.mulf %53, %95 : vector<2x16x16xf32>
    %228 = arith.subf %138, %225 : vector<2x16x16xf32>
    %229 = arith.subf %181, %226 : vector<2x16x16xf32>
    %230 = arith.subf %224, %227 : vector<2x16x16xf32>
    %cst_50 = arith.constant 2.000000e+00 : f32
    %231 = vector.broadcast %cst_50 : f32 to vector<2x16x16xf32>
    %232 = arith.mulf %231, %227 : vector<2x16x16xf32>
    %cst_51 = arith.constant 9.99999974E-5 : f32
    %233 = vector.broadcast %cst_51 : f32 to vector<2x16x16xf32>
    %234 = arith.addf %232, %233 : vector<2x16x16xf32>
    %cst_52 = arith.constant 2.000000e+00 : f32
    %235 = vector.broadcast %cst_52 : f32 to vector<2x16x16xf32>
    %236 = arith.mulf %235, %230 : vector<2x16x16xf32>
    %cst_53 = arith.constant 8.99999984E-4 : f32
    %237 = vector.broadcast %cst_53 : f32 to vector<2x16x16xf32>
    %238 = arith.addf %236, %237 : vector<2x16x16xf32>
    %239 = arith.mulf %234, %238 : vector<2x16x16xf32>
    %240 = arith.addf %225, %226 : vector<2x16x16xf32>
    %cst_54 = arith.constant 9.99999974E-5 : f32
    %241 = vector.broadcast %cst_54 : f32 to vector<2x16x16xf32>
    %242 = arith.addf %240, %241 : vector<2x16x16xf32>
    %243 = arith.addf %228, %229 : vector<2x16x16xf32>
    %cst_55 = arith.constant 8.99999984E-4 : f32
    %244 = vector.broadcast %cst_55 : f32 to vector<2x16x16xf32>
    %245 = arith.addf %243, %244 : vector<2x16x16xf32>
    %246 = arith.mulf %242, %245 : vector<2x16x16xf32>
    %247 = tpu.reciprocal %246 {approx = true} : vector<2x16x16xf32> -> vector<2x16x16xf32>
    %248 = arith.mulf %246, %247 : vector<2x16x16xf32>
    %cst_56 = arith.constant 2.000000e+00 : f32
    %249 = vector.broadcast %cst_56 : f32 to vector<2x16x16xf32>
    %250 = arith.subf %249, %248 : vector<2x16x16xf32>
    %251 = arith.mulf %247, %250 : vector<2x16x16xf32>
    %252 = arith.mulf %246, %251 : vector<2x16x16xf32>
    %cst_57 = arith.constant 2.000000e+00 : f32
    %253 = vector.broadcast %cst_57 : f32 to vector<2x16x16xf32>
    %254 = arith.subf %253, %252 : vector<2x16x16xf32>
    %255 = arith.mulf %251, %254 : vector<2x16x16xf32>
    %256 = arith.mulf %239, %255 : vector<2x16x16xf32>
    %cst_58 = arith.constant 1.000000e+00 : f32
    %257 = vector.broadcast %cst_58 : f32 to vector<2x16x16xf32>
    %258 = arith.subf %257, %256 : vector<2x16x16xf32>
    %cst_59 = arith.constant 5.000000e-01 : f32
    %259 = vector.broadcast %cst_59 : f32 to vector<2x16x16xf32>
    %260 = arith.mulf %258, %259 : vector<2x16x16xf32>
    %cst_60 = arith.constant 0.000000e+00 : f32
    %cst_61 = arith.constant 1.000000e+00 : f32
    %261 = vector.broadcast %cst_60 : f32 to vector<2x16x16xf32>
    %262 = arith.maximumf %261, %260 : vector<2x16x16xf32>
    %263 = vector.broadcast %cst_61 : f32 to vector<2x16x16xf32>
    %264 = arith.minimumf %263, %262 : vector<2x16x16xf32>
    %c0_62 = arith.constant 0 : index
    %c0_63 = arith.constant 0 : index
    %c0_64 = arith.constant 0 : index
    %265 = vector.load %arg3[%c0_62, %c0_63, %c0_64] : memref<2x16x16xf32, #tpu.memory_space<vmem>>, vector<2x16x16xf32>
    tpu.vector_store %arg3[%c0_62, %c0_63, %c0_64], %264 {strides = array<i32>} : memref<2x16x16xf32, #tpu.memory_space<vmem>>, vector<2x16x16xf32>,
    return
  }
  func.func @transform_0(%arg0: i32) -> (i32, i32, i32) {
    %c0_i32 = arith.constant 0 : i32
    %c0_i32_0 = arith.constant 0 : i32
    %c0_i32_1 = arith.constant 0 : i32
    return %arg0, %c0_i32, %c0_i32_0 : i32, i32, i32
  }
  func.func @transform_1(%arg0: i32) -> (i32, i32, i32) {
    %c0_i32 = arith.constant 0 : i32
    %c0_i32_0 = arith.constant 0 : i32
    %c0_i32_1 = arith.constant 0 : i32
    return %arg0, %c0_i32, %c0_i32_0 : i32, i32, i32
  }
  func.func @transform_2(%arg0: i32) -> (i32, i32, i32) {
    %c0_i32 = arith.constant 0 : i32
    %c0_i32_0 = arith.constant 0 : i32
    %c0_i32_1 = arith.constant 0 : i32
    return %arg0, %c0_i32, %c0_i32_0 : i32, i32, i32
  }
}

</mosaic_0001>

<bundles_post_ra>
// kernel: tpu_custom_call.1
= control target key start
LH: loop header
LB: loop body
LE: loop exit
PB: predicated region body
PF: predicated region fallthrough
CT: control target
= control target key end

     0   :  { %7 = vsyncpa [#allocation3], 0  ;;  %s3328_s0 = inlined_call_operand.hbm [shape: f32[8,16,16], index: 0, kind: input, shape index: {}]   ;;  %s3329_s1 = inlined_call_operand.hbm [shape: f32[8,16,16], index: 1, kind: input, shape index: {}]   ;;  %s3330_s2 = inlined_call_operand.hbm [shape: f32[8,16,16], index: 2, kind: output, shape index: {}]  }
   0x1   :  { %9 = vsyncpa [#allocation3 + $0x1], 0 }
   0x2   :  { %10 = vsyncpa [#allocation6], 0 }
   0x3   :  { %12 = vsyncpa [#allocation6 + $0x1], 0 }
   0x4   :  { %13 = vsyncpa [#allocation4], 0 }
   0x5   :  { %15 = vsyncpa [#allocation4 + $0x1], 0  ;;  %s1934_s9 = smov 0   ;;  %s1936_s10 = smov 0  }
   0x6   :  { %s1938_s11 = smov 0   ;;  %s1940_s12 = smov 0  }
   0x7 LB: > { %s1955_s13 = sadd.s32 4294967295, %s1902_s12   ;;  %s1669_s14 = sadd.s32 4294967294, %s1902_s12   ;;  %s1902_s12 = sphi %s1940_s12, %s3418_s12   ;;  %s1898_s11 = sphi %s1938_s11, %s3417_s11   ;;  %s1894_s10 = sphi %s1936_s10, %s3416_s10   ;;  %s1890_s9 = sphi %s1934_s9, %s3415_s9  }
   0x8   : > { %s1959_s15 = sadd.s32 1, %s1902_s12   ;;  %s28_s16 = sadd.s32 1, %s1898_s11 }
   0x9   : > { %s25_s17 = ssub.s32 %s1902_s12, %s1959_s15  ;;  %p35_p0 = scmp.ne.s32.totalorder %s1898_s11, %s1894_s10 }
   0xa   : > { %p26_p1 = scmp.eq.s32.totalorder %s25_s17, 0  ;;  %p36_p2 = scmp.eq.s32.totalorder %s1902_s12, 0 }
   0xb   : > { %p41_p3 = scmp.ne.s32.totalorder %s1894_s10, %s1890_s9  ;;  %p42_p4 = scmp.eq.s32.totalorder %s1955_s13, 0 }
   0xc   : > { %s1971_s18 = scalar_select %p26_p1, %s1898_s11, %s28_s16  }
   0xd   : > { %p1973_p5 = por %p36_p2, %p35_p0  ;;  %p1977_p6 = por %p42_p4, %p41_p3 }
   0xe   : > { %p91_p7 = scmp.eq.s32.totalorder %s1955_s13, 3  ;;  %p97_p8 = scmp.eq.s32.totalorder %s1669_s14, 3 }
   0xf   : > { %s3351_s20 = scalar_select %p1977_p6, 1, 0 }
  0x10   : > { %p1713_p9 = scmp.lt.s32.totalorder %s1902_s12, 4  ;;  %p1983_p10 = por %p91_p7, %p35_p0 }
  0x11   : > { %p1987_p11 = por %p97_p8, %p41_p3  ;;  %s1992_s23 = sand.u32 1, %s1898_s11  }
  0x12   : > { %s3352_s21 = scalar_select %p1983_p10, 1, 0 }
  0x13   : > { %s3353_s22 = scalar_select %p1987_p11, 1, 0 }
  0x14   : > { %s1691_s24 = sshll.u32 %s1902_s12, 9  ;;  %s1672_s25 = sshll.u32 %s1992_s23, 5 }
  0x15   : > { %s2001_s28 = scalar_lea.hbm %s3328_s0, %s1691_s24  ;;  %s121_s29 = scalar_lea.vmem [#allocation2], %s1672_s25 }
  0x16   : > { %s129_s30 = sshll.u32 %s121_s29, 4  ;;  %p2007_p12 = pnand %p1713_p9, %p1973_p5  ;;  %s2011_s30 = int_to_ptr.vmem [resolvable:$true] %s129_s30 }
  0x17   : > { %s118_s4 = scalar_lea.sflag [#allocation3], %s1992_s23  ;;  %s1778_s5 = scalar_lea.hbm %s2001_s28, 512 }
  0x18   : > { %p1779_p13 = scmp.ne.s32.totalorder %s2001_s28, %s1778_s5  ;;  %p1780_p0 = pneg %p2007_p12 }
  0x19   : > { %s1783_s8 = scalar_lea.hbm %s3328_s0, 2048  ;;  %p1784_p3 = scmp.lt.s32.totalorder %s2001_s28, %s3328_s0 }
  0x1a   : > { %p1781_p1 = pnand %p1780_p0, %p1779_p13  ;;  %p1785_p4 = scmp.lt.s32.totalorder %s1783_s8, %s1778_s5 }
  0x1c   : > { %p1782_p2 = pneg %p1781_p1  ;;  %p1786_p5 = por %p1785_p4, %p1784_p3 }
  0x1e   : > { %p1787_p7 = pnand %p1786_p5, %p1782_p2 }
  0x20   : > { %1790 = shalt.err (!%p1787_p7)
}
  0x21   : > { %s1791_s17 = scalar_lea.vmem %s2011_s30, 512  ;;  %s1904_s19 = smov [#allocation2]  }
  0x22   : > { %p1792_p8 = scmp.ne.s32.totalorder %s2011_s30, %s1791_s17  ;;  %s1796_s26 = sshll.u32 %s1904_s19, 4  ;;  %s1797_s26 = int_to_ptr.vmem [resolvable:$false] %s1796_s26 }
  0x23   : > { %s1798_s27 = scalar_lea.vmem %s1797_s26, 1024  ;;  %p1799_p1 = scmp.lt.s32.totalorder %s2011_s30, %s1797_s26 }
  0x24   : > { %p1794_p9 = pnand %p1792_p8, %p1780_p0  ;;  %p1800_p11 = scmp.lt.s32.totalorder %s1798_s27, %s1791_s17 }
  0x26   : > { %p1795_p13 = pneg %p1794_p9  ;;  %p1801_p10 = por %p1800_p11, %p1799_p1 }
  0x28   : > { %p1802_p3 = pnand %p1801_p10, %p1795_p13 }
  0x2a   : > { %1805 = shalt.err (!%p1802_p3)
}
  0x2b   : > { %s1905_s29 = smov 128   ;;  %s1906_s5 = smov 8  }
  0x2c   : > { %1705 = dma.hbm_to_vmem [thread:$0]  (!%p2007_p12), %s2001_s28, 512, %s2011_s30, %s118_s4, %s1905_s29, %s1905_s29, %s1906_s5  }
  0x2d   : > { %p1680_p10 = scmp.ge.s32.totalorder %s1902_s12, 1  ;;  %p159_p11 = scmp.lt.s32.totalorder %s1902_s12, 5 }
  0x2e   : > { %s2054_s14 = scalar_lea.hbm %s3329_s1, %s1691_s24  ;;  %s143_s16 = scalar_lea.vmem [#allocation5], %s1672_s25 }
  0x2f   : > { %p2045_p2 = pnand %p1680_p10, %p159_p11  ;;  %s151_s17 = sshll.u32 %s143_s16, 4  ;;  %s2058_s17 = int_to_ptr.vmem [resolvable:$true] %s151_s17 }
  0x30   : > { %s140_s28 = scalar_lea.sflag [#allocation6], %s1992_s23  ;;  %s1806_s30 = scalar_lea.hbm %s2054_s14, 512 }
  0x31   : > { %p1807_p4 = scmp.ne.s32.totalorder %s2054_s14, %s1806_s30  ;;  %s1811_s24 = scalar_lea.hbm %s3329_s1, 2048 }
  0x32   : > { %p1812_p8 = scmp.lt.s32.totalorder %s2054_s14, %s3329_s1  ;;  %p1813_p9 = scmp.lt.s32.totalorder %s1811_s24, %s1806_s30 }
  0x33   : > { %p1809_p5 = pnand %p1807_p4, %p1780_p0 }
  0x34   : > { %p1814_p13 = por %p1813_p9, %p1812_p8 }
  0x35   : > { %p1810_p7 = pneg %p1809_p5 }
  0x37   : > { %p1815_p1 = pnand %p1814_p13, %p1810_p7 }
  0x39   : > { %1818 = shalt.err (!%p1815_p1)
}
  0x3a   : > { %s1819_s23 = scalar_lea.vmem %s2058_s17, 512  ;;  %s1907_s25 = smov [#allocation5]  }
  0x3b   : > { %p1820_p3 = scmp.ne.s32.totalorder %s2058_s17, %s1819_s23  ;;  %s1824_s7 = sshll.u32 %s1907_s25, 4  ;;  %s1825_s7 = int_to_ptr.vmem [resolvable:$false] %s1824_s7 }
  0x3c   : > { %s1826_s8 = scalar_lea.vmem %s1825_s7, 1024  ;;  %p1827_p4 = scmp.lt.s32.totalorder %s2058_s17, %s1825_s7 }
  0x3d   : > { %p1822_p10 = pnand %p1820_p3, %p1780_p0  ;;  %p1828_p5 = scmp.lt.s32.totalorder %s1826_s8, %s1819_s23 }
  0x3f   : > { %p1823_p11 = pneg %p1822_p10  ;;  %p1829_p6 = por %p1828_p5, %p1827_p4 }
  0x41   : > { %p1830_p8 = pnand %p1829_p6, %p1823_p11 }
  0x43   : > { %1833 = shalt.err (!%p1830_p8)
}
  0x44   : > { %1708 = dma.hbm_to_vmem [thread:$0]  (!%p2007_p12), %s2054_s14, 512, %s2058_s17, %s140_s28, %s1905_s29, %s1905_s29, %s1906_s5  }
  0x45   : > { %163 = sbr.rel (%p2045_p2) target bundleno = 819 (0x333), region = 28 }
  0x4a   : > { %s2089_s16 = sand.u32 1, %s1894_s10   ;;  %p3356_p6 = scmp.ne.s32.totalorder %s3351_s20, 0 }
  0x4b   : > { %s2092_s30 = sshll.u32 %s2089_s16, 5  ;;  %s166_s4 = scalar_lea.sflag [#allocation3], %s2089_s16 }
  0x4c   : > { %s169_s3 = scalar_lea.vmem [#allocation2], %s2092_s30 }
  0x4d   : > { %1877 = dma.done.wait (%p3356_p6), %s166_s4, 512  }
  0x4e   : > { %1879 = vsyncadd (%p3356_p6), %s166_s4, 4294966784  ;;  %s175_s29 = scalar_lea.sflag [#allocation6], %s2089_s16  ;;  %s2102_s5 = scalar_lea.vmem [#allocation5], %s2092_s30 }
  0x4f   : > { %1881 = dma.done.wait (%p3356_p6), %s175_s29, 512  }
  0x50   : > { %1883 = vsyncadd (%p3356_p6), %s175_s29, 4294966784  ;;  %v2108_v0 = vld [vmem:[%s169_s3 + $0x10] sm:$0xff]  ;;  %v2110_v1 = vld [vmem:[%s169_s3] sm:$0xff]  ;;  %s1908_s6 = smov 16   ;;  %s1909_s20 = smov 15   ;;  %v3335_v8 = vmov 0  }
  0x51   : > { %233 = vrot.lane.b32.xlu1 %v2108_v0, %s1908_s6  ;;  %227 = vrot.lane.b32.xlu0 %v2110_v1, %s1908_s6  ;;  %v2116_v2 = vld [vmem:[%s169_s3 + $0x18] sm:$0xff]  ;;  %v2118_v3 = vld [vmem:[%s169_s3 + $0x8] sm:$0xff]  ;;  %v291_v5 = vmul.f32 2.0, %v2110_v1  ;;  %s1910_s14 = smov 127   ;;  %v293_v7 = vmul.f32 2.0, %v2108_v0  ;;  %s1911_s17 = smov 1   ;;  %v2188_v18 = vmul.f32 %v2110_v1, %v2110_v1  ;;  %v2200_v20 = vmul.f32 %v2108_v0, %v2108_v0 }
  0x52   : > { %v292_v4 = vmul.f32 2.0, %v2118_v3  ;;  %v294_v6 = vmul.f32 2.0, %v2116_v2  ;;  %1761 = vset.pattern.permute.xlu0 %v3335_v8  ;;  %v3333_v9 = vmov 15   ;;  %v2147_v10 = vld [vmem:[%s2102_s5 + $0x8] sm:$0xff]  ;;  %v2150_v11 = vld [vmem:[%s2102_s5] sm:$0xff]  ;;  %v2157_v12 = vld [vmem:[%s2102_s5 + $0x18] sm:$0xff]  ;;  %v2192_v19 = vmul.f32 %v2118_v3, %v2118_v3 }
  0x53   : > { %1759 = vset.pattern.permute.xlu1 %v3333_v9  ;;  %v2160_v13 = vld [vmem:[%s2102_s5 + $0x10] sm:$0xff]  ;;  %v534_v14 = vmul.f32 2.0, %v2147_v10  ;;  %v533_v15 = vmul.f32 2.0, %v2150_v11  ;;  %v536_v16 = vmul.f32 2.0, %v2157_v12  ;;  %v2204_v21 = vmul.f32 %v2116_v2, %v2116_v2  ;;  %s1914_s28 = smov 14   ;;  %s1915_s19 = smov 113  }
  0x54   : > { %v535_v17 = vmul.f32 2.0, %v2160_v13  ;;  %v2212_v22 = vmul.f32 %v2150_v11, %v2150_v11  ;;  %v2216_v23 = vmul.f32 %v2147_v10, %v2147_v10  ;;  %v2224_v24 = vmul.f32 %v2160_v13, %v2160_v13  ;;  %s203_s24 = scalar_lea.vmem [#allocation7], %s2092_s30  ;;  %s1695_s26 = sshll.u32 %s1955_s13, 9 }
  0x55   : > { %236 = vrot.lane.b32.xlu1 %v2116_v2, %s1908_s6  ;;  %230 = vrot.lane.b32.xlu0 %v2118_v3, %s1908_s6  ;;  %v2228_v25 = vmul.f32 %v2157_v12, %v2157_v12  ;;  %v2236_v26 = vmul.f32 %v2147_v10, %v2118_v3  ;;  %v2240_v27 = vmul.f32 %v2150_v11, %v2110_v1  ;;  %vm226_vm0 = vcmask 1047680   ;;  %s1573_s27 = sshll.u32 %s203_s24, 4  ;;  %s3283_s7 = scalar_lea.hbm %s3330_s2, %s1695_s26  ;;  %s3285_s27 = int_to_ptr.vmem [resolvable:$true] %s1573_s27 }
  0x56   : > { %v2290_v60 = vmul.f32 %v2157_v12, %v2116_v2  ;;  %vm1553_vm7 = vcmask 130048   ;;  %s1559_s13 = scalar_lea.sflag [#allocation4], %s2089_s16  ;;  %s1834_s8 = scalar_lea.vmem %s3285_s27, 512 }
  0x57   : > { %3357 = vst [vmem:[#allocation11_spill] sm:$0xff] %v2240_v27  ;;  %p1835_p12 = scmp.ne.s32.totalorder %s3285_s27, %s1834_s8  ;;  %p3413_p0 = scmp.ne.s32.totalorder %s3352_s21, 0 }
  0x58   : > { %3358 = vst [vmem:[#allocation12_spill] sm:$0xff] %v2290_v60  ;;  %s1916_s30 = smov [#allocation7]  }
  0x59   : > { %257 = vrot.lane.b32.xlu1 %v2118_v3, %s1909_s20  ;;  %255 = vrot.lane.b32.xlu0 %v2110_v1, %s1909_s20  ;;  %p1836_p2 = pnand %p1835_p12, %p3413_p0  ;;  %s1838_s4 = sshll.u32 %s1916_s30, 4  ;;  %s1839_s4 = int_to_ptr.vmem [resolvable:$false] %s1838_s4 }
  0x5a   : > { %s1840_s3 = scalar_lea.vmem %s1839_s4, 1024  ;;  %p1841_p9 = scmp.lt.s32.totalorder %s3285_s27, %s1839_s4 }
  0x5b   : > { %p1837_p7 = pneg %p1836_p2  ;;  %p1842_p13 = scmp.lt.s32.totalorder %s1840_s3, %s1834_s8 }
  0x5d   : > { %261 = vrot.lane.b32.xlu1 %v2116_v2, %s1909_s20  ;;  %259 = vrot.lane.b32.xlu0 %v2108_v0, %s1909_s20  ;;  %p1843_p1 = por %p1842_p13, %p1841_p9 }
  0x5f   : > { %p1844_p3 = pnand %p1843_p1, %p1837_p7 }
  0x61   : > { %301 = vrot.lane.b32.xlu1 %v292_v4, %s1910_s14  ;;  %299 = vrot.lane.b32.xlu0 %v291_v5, %s1910_s14 }
  0x65   : > { %305 = vrot.lane.b32.xlu1 %v294_v6, %s1910_s14  ;;  %303 = vrot.lane.b32.xlu0 %v293_v7, %s1910_s14 }
  0x69   : > { %317 = vrot.lane.b32.xlu1 %v292_v4, %s1911_s17  ;;  %315 = vrot.lane.b32.xlu0 %v291_v5, %s1911_s17 }
  0x6d   : > { %321 = vrot.lane.b32.xlu1 %v294_v6, %s1911_s17  ;;  %319 = vrot.lane.b32.xlu0 %v293_v7, %s1911_s17 }
  0x71   : > { %472 = vrot.lane.b32.xlu1 %v2147_v10, %s1908_s6  ;;  %469 = vrot.lane.b32.xlu0 %v2150_v11, %s1908_s6 }
  0x75   : > { %478 = vrot.lane.b32.xlu1 %v2157_v12, %s1908_s6  ;;  %475 = vrot.lane.b32.xlu0 %v2160_v13, %s1908_s6 }
  0x79   : > { %499 = vrot.lane.b32.xlu1 %v2147_v10, %s1909_s20  ;;  %497 = vrot.lane.b32.xlu0 %v2150_v11, %s1909_s20 }
  0x7d   : > { %503 = vrot.lane.b32.xlu1 %v2157_v12, %s1909_s20  ;;  %501 = vrot.lane.b32.xlu0 %v2160_v13, %s1909_s20 }
  0x81   : > { %543 = vrot.lane.b32.xlu1 %v534_v14, %s1910_s14  ;;  %541 = vrot.lane.b32.xlu0 %v533_v15, %s1910_s14 }
  0x85   : > { %547 = vrot.lane.b32.xlu1 %v536_v16, %s1910_s14  ;;  %545 = vrot.lane.b32.xlu0 %v535_v17, %s1910_s14 }
  0x89   : > { %559 = vrot.lane.b32.xlu1 %v534_v14, %s1911_s17  ;;  %557 = vrot.lane.b32.xlu0 %v533_v15, %s1911_s17 }
  0x8d   : > { %561 = vrot.lane.b32.xlu0 %v535_v17, %s1911_s17  ;;  %563 = vrot.lane.b32.xlu1 %v536_v16, %s1911_s17 }
  0x91   : > { %713 = vrot.lane.b32.xlu0 %v2188_v18, %s1908_s6  ;;  %716 = vrot.lane.b32.xlu1 %v2192_v19, %s1908_s6 }
  0x95   : > { %719 = vrot.lane.b32.xlu0 %v2200_v20, %s1908_s6  ;;  %722 = vrot.lane.b32.xlu1 %v2204_v21, %s1908_s6 }
  0x99   : > { %957 = vrot.lane.b32.xlu0 %v2212_v22, %s1908_s6  ;;  %960 = vrot.lane.b32.xlu1 %v2216_v23, %s1908_s6 }
  0x9d   : > { %963 = vrot.lane.b32.xlu0 %v2224_v24, %s1908_s6  ;;  %966 = vrot.lane.b32.xlu1 %v2228_v25, %s1908_s6 }
  0xa1   : > { %1204 = vrot.lane.b32.xlu0 %v2236_v26, %s1908_s6  ;;  %1201 = vrot.lane.b32.xlu1 %v2240_v27, %s1908_s6 }
  0xc3   : > { %v234_v28 = vpop.permute.xlu1 %233  ;;  %v228_v29 = vpop.permute.xlu0 %227 }
  0xc4   : > { %v229_v30 = vsel %vm226_vm0, %v228_v29, %v2110_v1  ;;  %v235_v34 = vsel %vm226_vm0, %v234_v28, %v2108_v0 }
  0xc5   : > { %239 = vrot.lane.b32.xlu0 %v229_v30, %s1908_s6 }
  0xc7   : > { %v237_v31 = vpop.permute.xlu1 %236  ;;  %v231_v32 = vpop.permute.xlu0 %230 }
  0xc8   : > { %v232_v33 = vsel %vm226_vm0, %v231_v32, %v2118_v3  ;;  %v238_v37 = vsel %vm226_vm0, %v237_v31, %v2116_v2 }
  0xc9   : > { %241 = vrot.lane.b32.xlu1 %v232_v33, %s1908_s6  ;;  %243 = vrot.lane.b32.xlu0 %v235_v34, %s1908_s6 }
  0xcb   : > { %v2255_v35 = vpop.permute.xlu1 %257  ;;  %v2257_v36 = vpop.permute.xlu0 %255 }
  0xcd   : > { %245 = vrot.lane.b32.xlu1 %v238_v37, %s1908_s6 }
  0xcf   : > { %v2262_v38 = vpop.permute.xlu1 %261  ;;  %v2264_v39 = vpop.permute.xlu0 %259 }
  0xd3   : > { %v302_v40 = vpop.permute.xlu1 %301  ;;  %v300_v41 = vpop.permute.xlu0 %299 }
  0xd4   : > { %v312_v56 = vadd.f32 %v302_v40, %v2118_v3  ;;  %v311_v6 = vadd.f32 %v300_v41, %v2110_v1  ;;  %v2316_v41 = vmul.f32 %v2160_v13, %v2108_v0 }
  0xd6   : > { %3359 = vst [vmem:[#allocation13_spill] sm:$0xff] %v2316_v41 }
  0xd7   : > { %v306_v42 = vpop.permute.xlu1 %305  ;;  %v304_v43 = vpop.permute.xlu0 %303 }
  0xd8   : > { %v313_v16 = vadd.f32 %v304_v43, %v2108_v0  ;;  %v314_v29 = vadd.f32 %v306_v42, %v2116_v2 }
  0xdb   : > { %v318_v44 = vpop.permute.xlu1 %317  ;;  %v2266_v45 = vpop.permute.xlu0 %315 }
  0xdc   : > { %v328_v57 = vadd.f32 %v318_v44, %v2118_v3 }
  0xdf   : > { %v2268_v46 = vpop.permute.xlu1 %321  ;;  %v320_v47 = vpop.permute.xlu0 %319 }
  0xe0   : > { %v329_v61 = vadd.f32 %v320_v47, %v2108_v0 }
  0xe3   : > { %v473_v48 = vpop.permute.xlu1 %472  ;;  %v470_v49 = vpop.permute.xlu0 %469 }
  0xe4   : > { %v474_v50 = vsel %vm226_vm0, %v473_v48, %v2147_v10  ;;  %v471_v51 = vsel %vm226_vm0, %v470_v49, %v2150_v11 }
  0xe5   : > { %483 = vrot.lane.b32.xlu1 %v474_v50, %s1908_s6  ;;  %481 = vrot.lane.b32.xlu0 %v471_v51, %s1908_s6 }
  0xe7   : > { %v479_v52 = vpop.permute.xlu1 %478  ;;  %v476_v53 = vpop.permute.xlu0 %475 }
  0xe8   : > { %v480_v54 = vsel %vm226_vm0, %v479_v52, %v2157_v12  ;;  %v477_v55 = vsel %vm226_vm0, %v476_v53, %v2160_v13 }
  0xe9   : > { %487 = vrot.lane.b32.xlu1 %v480_v54, %s1908_s6  ;;  %485 = vrot.lane.b32.xlu0 %v477_v55, %s1908_s6 }
  0xeb   : > { %v2284_v58 = vpop.permute.xlu1 %499  ;;  %v2286_v59 = vpop.permute.xlu0 %497 }
  0xed   : > { %338 = vperm.xlu1 %1759, %v328_v57   ;;  %378 = vperm.xlu0 %1761, %v312_v56  }
  0xef   : > { %v2293_v62 = vpop.permute.xlu1 %503  ;;  %v2295_v63 = vpop.permute.xlu0 %501 }
  0xf1   : > { %343 = vperm.xlu1 %1759, %v329_v61   ;;  %1210 = vrot.lane.b32.xlu0 %v2290_v60, %s1908_s6 }
  0xf3   : > { %v544_v4 = vpop.permute.xlu1 %543  ;;  %v542_v5 = vpop.permute.xlu0 %541 }
  0xf4   : > { %v554_v7 = vadd.f32 %v544_v4, %v2147_v10  ;;  %v553_v49 = vadd.f32 %v542_v5, %v2150_v11 }
  0xf5   : > { %1760 = vset.pattern.permute.xlu1 %v3335_v8 }
  0xf6   : > { %373 = vperm.xlu1 %1760, %v311_v6   ;;  %620 = vperm.xlu0 %1761, %v554_v7  }
  0xf7   : > { %v548_v14 = vpop.permute.xlu1 %547  ;;  %v546_v15 = vpop.permute.xlu0 %545 }
  0xf8   : > { %v555_v53 = vadd.f32 %v546_v15, %v2160_v13  ;;  %v556_v55 = vadd.f32 %v548_v14, %v2157_v12 }
  0xfa   : > { %383 = vperm.xlu1 %1760, %v313_v16  }
  0xfb   : > { %v560_v17 = vpop.permute.xlu1 %559  ;;  %v2303_v28 = vpop.permute.xlu0 %557 }
  0xfc   : > { %v570_v30 = vadd.f32 %v560_v17, %v2147_v10 }
  0xfe   : > { %388 = vperm.xlu1 %1760, %v314_v29  }
  0xff   : > { %v562_v31 = vpop.permute.xlu0 %561  ;;  %v2307_v32 = vpop.permute.xlu1 %563 }
 0x100   : > { %v571_v33 = vadd.f32 %v562_v31, %v2160_v13 }
 0x102   : > { %1762 = vset.pattern.permute.xlu1 %v3333_v9 }
 0x103   : > { %580 = vperm.xlu1 %1762, %v570_v30   ;;  %v714_v34 = vpop.permute.xlu0 %713  ;;  %v717_v37 = vpop.permute.xlu1 %716 }
 0x104   : > { %v715_v40 = vsel %vm226_vm0, %v714_v34, %v2188_v18  ;;  %v718_v56 = vsel %vm226_vm0, %v717_v37, %v2192_v19 }
 0x105   : > { %725 = vrot.lane.b32.xlu0 %v715_v40, %s1908_s6 }
 0x107   : > { %585 = vperm.xlu1 %1762, %v571_v33   ;;  %v720_v42 = vpop.permute.xlu0 %719  ;;  %v723_v43 = vpop.permute.xlu1 %722 }
 0x108   : > { %v721_v44 = vsel %vm226_vm0, %v720_v42, %v2200_v20  ;;  %v724_v4 = vsel %vm226_vm0, %v723_v43, %v2204_v21 }
 0x109   : > { %729 = vrot.lane.b32.xlu0 %v721_v44, %s1908_s6 }
 0x10b   : > { %1207 = vrot.lane.b32.xlu1 %v2316_v41, %s1908_s6  ;;  %v958_v47 = vpop.permute.xlu0 %957  ;;  %v961_v50 = vpop.permute.xlu1 %960 }
 0x10c   : > { %1763 = vset.pattern.permute.xlu1 %v3335_v8  ;;  %v959_v48 = vsel %vm226_vm0, %v958_v47, %v2212_v22  ;;  %v962_v5 = vsel %vm226_vm0, %v961_v50, %v2216_v23  ;;  %v778_v47 = vmul.f32 2.0, %v2192_v19 }
 0x10d   : > { %969 = vrot.lane.b32.xlu0 %v959_v48, %s1908_s6 }
 0x10f   : > { %615 = vperm.xlu1 %1763, %v553_v49   ;;  %v964_v51 = vpop.permute.xlu0 %963  ;;  %v967_v54 = vpop.permute.xlu1 %966  ;;  %v780_v49 = vmul.f32 2.0, %v2204_v21 }
 0x110   : > { %v965_v52 = vsel %vm226_vm0, %v964_v51, %v2224_v24  ;;  %v968_v6 = vsel %vm226_vm0, %v967_v54, %v2228_v25 }
 0x111   : > { %973 = vrot.lane.b32.xlu0 %v965_v52, %s1908_s6 }
 0x113   : > { %625 = vperm.xlu1 %1763, %v555_v53   ;;  %v1202_v57 = vpop.permute.xlu1 %1201  ;;  %v1205_v7 = vpop.permute.xlu0 %1204  ;;  %v1021_v53 = vmul.f32 2.0, %v2212_v22 }
 0x114   : > { %v1203_v61 = vsel %vm226_vm0, %v1202_v57, %v2240_v27  ;;  %v1206_v14 = vsel %vm226_vm0, %v1205_v7, %v2236_v26  ;;  %v1024_v57 = vmul.f32 2.0, %v2228_v25  ;;  %v1023_v7 = vmul.f32 2.0, %v2224_v24 }
 0x115   : > { %741 = vrot.lane.b32.xlu0 %v2188_v18, %s1909_s20 }
 0x117   : > { %630 = vperm.xlu1 %1763, %v556_v55   ;;  %v1022_v55 = vmul.f32 2.0, %v2216_v23 }
 0x119   : > { %745 = vrot.lane.b32.xlu0 %v2200_v20, %s1909_s20 }
 0x11b   : > { %727 = vrot.lane.b32.xlu1 %v718_v56, %s1908_s6 }
 0x11c   : > { %1764 = vset.pattern.permute.xlu1 %v3333_v9  ;;  %v1267_v9 = vmul.f32 2.0, %v2316_v41 }
 0x11d   : > { %1213 = vrot.lane.b32.xlu0 %v1203_v61, %s1908_s6 }
 0x11f   : > { %731 = vrot.lane.b32.xlu1 %v724_v4, %s1908_s6  ;;  %v777_v4 = vmul.f32 2.0, %v2188_v18 }
 0x123   : > { %971 = vrot.lane.b32.xlu1 %v962_v5, %s1908_s6  ;;  %v779_v5 = vmul.f32 2.0, %v2200_v20 }
 0x127   : > { %975 = vrot.lane.b32.xlu1 %v968_v6, %s1908_s6 }
 0x12b   : > { %743 = vrot.lane.b32.xlu1 %v2192_v19, %s1909_s20 }
 0x12f   : > { %747 = vrot.lane.b32.xlu1 %v2204_v21, %s1909_s20 }
 0x133   : > { %1215 = vrot.lane.b32.xlu1 %v1206_v14, %s1908_s6 }
 0x137   : > { %v2360_v15 = vpop.permute.xlu0 %239 }
 0x13b   : > { %v242_v16 = vpop.permute.xlu1 %241  ;;  %v2362_v17 = vpop.permute.xlu0 %243 }
 0x13f   : > { %v246_v29 = vpop.permute.xlu1 %245 }
 0x157   : > { %v484_v30 = vpop.permute.xlu1 %483  ;;  %v2364_v31 = vpop.permute.xlu0 %481 }
 0x15b   : > { %v488_v33 = vpop.permute.xlu1 %487  ;;  %v2366_v34 = vpop.permute.xlu0 %485 }
 0x168   : > { %v2368_v37 = vpop.permute.xlu1 %338  ;;  %v2370_v40 = vpop.permute.xlu0 %378 }
 0x169   : > { %3360 = vst [vmem:[#allocation14_spill] sm:$0xff] %v2368_v37  ;;  %3361 = vst [vmem:[#allocation15_spill] sm:$0xff] %v2370_v40 }
 0x16c   : > { %v2372_v42 = vpop.permute.xlu1 %343  ;;  %v1211_v43 = vpop.permute.xlu0 %1210 }
 0x16d   : > { %3362 = vst [vmem:[#allocation16_spill] sm:$0xff] %v2372_v42  ;;  %v1212_v44 = vsel %vm226_vm0, %v1211_v43, %v2290_v60  ;;  %v2422_v43 = vsel %vm226_vm0, %v242_v16, %v2118_v3  ;;  %v2438_v3 = vsel %vm226_vm0, %v484_v30, %v2147_v10  ;;  %v2446_v16 = vsel %vm226_vm0, %v488_v33, %v2157_v12 }
 0x16e   : > { %1219 = vrot.lane.b32.xlu1 %v1212_v44, %s1908_s6  ;;  %v2465_v30 = vsel %vm226_vm0, %v2360_v15, %v2110_v1 }
 0x171   : > { %v2378_v48 = vpop.permute.xlu1 %373 }
 0x172   : > { %3363 = vst [vmem:[#allocation17_spill] sm:$0xff] %v2378_v48  ;;  %787 = vrot.lane.b32.xlu1 %v778_v47, %s1910_s14 }
 0x175   : > { %v2382_v50 = vpop.permute.xlu1 %383 }
 0x176   : > { %3364 = vst [vmem:[#allocation18_spill] sm:$0xff] %v2382_v50  ;;  %791 = vrot.lane.b32.xlu1 %v780_v49, %s1910_s14 }
 0x179   : > { %v2385_v51 = vpop.permute.xlu1 %388 }
 0x17a   : > { %3365 = vst [vmem:[#allocation19_spill] sm:$0xff] %v2385_v51  ;;  %803 = vrot.lane.b32.xlu1 %v778_v47, %s1911_s17  ;;  %v2431_v47 = vsel %vm226_vm0, %v246_v29, %v2116_v2 }
 0x17e   : > { %v2388_v52 = vpop.permute.xlu1 %580  ;;  %807 = vrot.lane.b32.xlu1 %v780_v49, %s1911_s17 }
 0x17f   : > { %3366 = vst [vmem:[#allocation20_spill] sm:$0xff] %v2388_v52 }
 0x182   : > { %v2392_v54 = vpop.permute.xlu1 %585  ;;  %1045 = vrot.lane.b32.xlu1 %v1021_v53, %s1911_s17 }
 0x183   : > { %3367 = vst [vmem:[#allocation21_spill] sm:$0xff] %v2392_v54 }
 0x186   : > { %v1208_v56 = vpop.permute.xlu1 %1207  ;;  %1047 = vrot.lane.b32.xlu1 %v1022_v55, %s1911_s17 }
 0x187   : > { %v1209_v61 = vsel %vm226_vm0, %v1208_v56, %v2316_v41 }
 0x188   : > { %1217 = vrot.lane.b32.xlu0 %v1209_v61, %s1908_s6 }
 0x18a   : > { %1051 = vrot.lane.b32.xlu1 %v1024_v57, %s1911_s17  ;;  %v2408_v6 = vpop.permute.xlu1 %615 }
 0x18b   : > { %3368 = vst [vmem:[#allocation22_spill] sm:$0xff] %v2408_v6 }
 0x18c   : > { %785 = vrot.lane.b32.xlu0 %v777_v4, %s1910_s14 }
 0x18e   : > { %1031 = vrot.lane.b32.xlu1 %v1022_v55, %s1910_s14  ;;  %v2415_v14 = vpop.permute.xlu1 %625  ;;  %v2469_v55 = vpop.permute.xlu0 %620 }
 0x18f   : > { %3369 = vst [vmem:[#allocation23_spill] sm:$0xff] %v2415_v14  ;;  %3371 = vst [vmem:[#allocation25_spill] sm:$0xff] %v2469_v55 }
 0x190   : > { %789 = vrot.lane.b32.xlu0 %v779_v5, %s1910_s14 }
 0x192   : > { %1035 = vrot.lane.b32.xlu1 %v1024_v57, %s1910_s14  ;;  %v2426_v44 = vpop.permute.xlu1 %630  ;;  %v2480_v57 = vsel %vm226_vm0, %v2362_v17, %v2108_v0  ;;  %v726_v15 = vpop.permute.xlu0 %725  ;;  %v1266_v0 = vmul.f32 2.0, %v2236_v26  ;;  %v2503_v17 = vsel %vm226_vm0, %v2366_v34, %v2160_v13 }
 0x193   : > { %3370 = vst [vmem:[#allocation24_spill] sm:$0xff] %v2426_v44 }
 0x194   : > { %801 = vrot.lane.b32.xlu0 %v777_v4, %s1911_s17 }
 0x196   : > { %987 = vrot.lane.b32.xlu1 %v2216_v23, %s1909_s20  ;;  %v728_v49 = vpop.permute.xlu1 %727 }
 0x198   : > { %805 = vrot.lane.b32.xlu0 %v779_v5, %s1911_s17  ;;  %v2493_v5 = vsel %vm226_vm0, %v2364_v31, %v2150_v11  ;;  %v2509_v31 = vsel %vm226_vm0, %v726_v15, %v2188_v18 }
 0x19a   : > { %991 = vrot.lane.b32.xlu1 %v2228_v25, %s1909_s20  ;;  %v732_v29 = vpop.permute.xlu1 %731 }
 0x19b   : > { %v2460_v10 = vsel %vm226_vm0, %v732_v29, %v2204_v21 }
 0x19c   : > { %1049 = vrot.lane.b32.xlu0 %v1023_v7, %s1911_s17 }
 0x19e   : > { %277 = vrot.lane.b32.xlu1 %v2422_v43, %s1914_s28  ;;  %v972_v33 = vpop.permute.xlu1 %971 }
 0x19f   : > { %v2475_v56 = vsel %vm226_vm0, %v972_v33, %v2216_v23 }
 0x1a0   : > { %1029 = vrot.lane.b32.xlu0 %v1021_v53, %s1910_s14  ;;  %v2452_v53 = vsel %vm226_vm0, %v728_v49, %v2192_v19  ;;  %v1268_v49 = vmul.f32 2.0, %v2290_v60 }
 0x1a2   : > { %281 = vrot.lane.b32.xlu1 %v2431_v47, %s1914_s28  ;;  %v976_v61 = vpop.permute.xlu1 %975 }
 0x1a3   : > { %v2488_v4 = vsel %vm226_vm0, %v976_v61, %v2228_v25 }
 0x1a4   : > { %1033 = vrot.lane.b32.xlu0 %v1023_v7, %s1910_s14  ;;  %v730_v7 = vpop.permute.xlu0 %729 }
 0x1a5   : > { %v2517_v29 = vsel %vm226_vm0, %v730_v7, %v2200_v20 }
 0x1a6   : > { %519 = vrot.lane.b32.xlu1 %v2438_v3, %s1914_s28  ;;  %3372 = vst [vmem:[#allocation26_spill] sm:$0xff] %v2517_v29  ;;  %v2526_v33 = vpop.permute.xlu1 %743 }
 0x1a8   : > { %985 = vrot.lane.b32.xlu0 %v2212_v22, %s1909_s20  ;;  %v970_v13 = vpop.permute.xlu0 %969 }
 0x1a9   : > { %v2524_v34 = vsel %vm226_vm0, %v970_v13, %v2212_v22  ;;  %v1265_v13 = vmul.f32 2.0, %v2240_v27 }
 0x1aa   : > { %523 = vrot.lane.b32.xlu1 %v2446_v16, %s1914_s28  ;;  %3373 = vst [vmem:[#allocation27_spill] sm:$0xff] %v2524_v34  ;;  %v2536_v7 = vpop.permute.xlu1 %747 }
 0x1ac   : > { %989 = vrot.lane.b32.xlu0 %v2224_v24, %s1909_s20  ;;  %v974_v15 = vpop.permute.xlu0 %973 }
 0x1ad   : > { %v2533_v61 = vsel %vm226_vm0, %v974_v15, %v2224_v24 }
 0x1ae   : > { %763 = vrot.lane.b32.xlu1 %v2452_v53, %s1914_s28  ;;  %3374 = vst [vmem:[#allocation28_spill] sm:$0xff] %v2533_v61 }
 0x1b0   : > { %275 = vrot.lane.b32.xlu0 %v2465_v30, %s1914_s28  ;;  %v2554_v15 = vpop.permute.xlu0 %741 }
 0x1b1   : > { %3376 = vst [vmem:[#allocation30_spill] sm:$0xff] %v2554_v15 }
 0x1b2   : > { %767 = vrot.lane.b32.xlu1 %v2460_v10, %s1914_s28 }
 0x1b4   : > { %279 = vrot.lane.b32.xlu0 %v2480_v57, %s1914_s28  ;;  %v2558_v8 = vpop.permute.xlu0 %745 }
 0x1b5   : > { %3377 = vst [vmem:[#allocation31_spill] sm:$0xff] %v2558_v8 }
 0x1b6   : > { %1007 = vrot.lane.b32.xlu1 %v2475_v56, %s1914_s28 }
 0x1b8   : > { %517 = vrot.lane.b32.xlu0 %v2493_v5, %s1914_s28  ;;  %v1214_v55 = vpop.permute.xlu0 %1213 }
 0x1ba   : > { %1011 = vrot.lane.b32.xlu1 %v2488_v4, %s1914_s28 }
 0x1bc   : > { %521 = vrot.lane.b32.xlu0 %v2503_v17, %s1914_s28 }
 0x1be   : > { %1291 = vrot.lane.b32.xlu1 %v1266_v0, %s1911_s17 }
 0x1c0   : > { %761 = vrot.lane.b32.xlu0 %v2509_v31, %s1914_s28 }
 0x1c2   : > { %1295 = vrot.lane.b32.xlu1 %v1268_v49, %s1911_s17 }
 0x1c4   : > { %765 = vrot.lane.b32.xlu0 %v2517_v29, %s1914_s28 }
 0x1c6   : > { %1275 = vrot.lane.b32.xlu1 %v1266_v0, %s1910_s14  ;;  %v1216_v0 = vpop.permute.xlu1 %1215 }
 0x1c8   : > { %1005 = vrot.lane.b32.xlu0 %v2524_v34, %s1914_s28 }
 0x1ca   : > { %1279 = vrot.lane.b32.xlu1 %v1268_v49, %s1910_s14  ;;  %v2549_v49 = vsel %vm226_vm0, %v1216_v0, %v2236_v26 }
 0x1cb   : > { %3375 = vst [vmem:[#allocation29_spill] sm:$0xff] %v2549_v49 }
 0x1cc   : > { %1009 = vrot.lane.b32.xlu0 %v2533_v61, %s1914_s28 }
 0x1ce   : > { %1231 = vrot.lane.b32.xlu1 %v2236_v26, %s1909_s20 }
 0x1d0   : > { %1289 = vrot.lane.b32.xlu0 %v1265_v13, %s1911_s17 }
 0x1d2   : > { %1235 = vrot.lane.b32.xlu1 %v2290_v60, %s1909_s20 }
 0x1d4   : > { %1293 = vrot.lane.b32.xlu0 %v1267_v9, %s1911_s17 }
 0x1d6   : > { %1251 = vrot.lane.b32.xlu1 %v2549_v49, %s1914_s28 }
 0x1d8   : > { %1273 = vrot.lane.b32.xlu0 %v1265_v13, %s1910_s14 }
 0x1dc   : > { %1277 = vrot.lane.b32.xlu0 %v1267_v9, %s1910_s14  ;;  %v2572_v9 = vsel %vm226_vm0, %v1214_v55, %v2240_v27 }
 0x1dd   : > { %3379 = vst [vmem:[#allocation33_spill] sm:$0xff] %v2572_v9 }
 0x1e0   : > { %v1220_v44 = vpop.permute.xlu1 %1219  ;;  %1229 = vrot.lane.b32.xlu0 %v2240_v27, %s1909_s20 }
 0x1e1   : > { %v2564_v0 = vsel %vm226_vm0, %v1220_v44, %v2290_v60 }
 0x1e2   : > { %3378 = vst [vmem:[#allocation32_spill] sm:$0xff] %v2564_v0  ;;  %1255 = vrot.lane.b32.xlu1 %v2564_v0, %s1914_s28 }
 0x1e4   : > { %v788_v52 = vpop.permute.xlu1 %787  ;;  %1233 = vrot.lane.b32.xlu0 %v2316_v41, %s1909_s20 }
 0x1e5   : > { %v798_v6 = vadd.f32 %v788_v52, %v2192_v19 }
 0x1e8   : > { %v792_v13 = vpop.permute.xlu1 %791  ;;  %1249 = vrot.lane.b32.xlu0 %v2572_v9, %s1914_s28 }
 0x1ec   : > { %v2576_v51 = vpop.permute.xlu1 %803 }
 0x1f0   : > { %v2578_v44 = vpop.permute.xlu1 %807 }
 0x1f4   : > { %v1046_v40 = vpop.permute.xlu1 %1045 }
 0x1f5   : > { %v1057_v52 = vadd.f32 %v1046_v40, %v2212_v22 }
 0x1f8   : > { %v2580_v37 = vpop.permute.xlu1 %1047 }
 0x1fa   : > { %v1218_v14 = vpop.permute.xlu0 %1217 }
 0x1fb   : > { %v2584_v54 = vsel %vm226_vm0, %v1218_v14, %v2316_v41 }
 0x1fc   : > { %3380 = vst [vmem:[#allocation34_spill] sm:$0xff] %v2584_v54  ;;  %v2587_v55 = vpop.permute.xlu1 %1051  ;;  %1253 = vrot.lane.b32.xlu0 %v2584_v54, %s1914_s28 }
 0x1fe   : > { %v786_v50 = vpop.permute.xlu0 %785 }
 0x1ff   : > { %v797_v15 = vadd.f32 %v786_v50, %v2188_v18  ;;  %v800_v50 = vadd.f32 %v792_v13, %v2204_v21 }
 0x200   : > { %v1032_v42 = vpop.permute.xlu1 %1031  ;;  %864 = vperm.xlu0 %1761, %v798_v6  }
 0x202   : > { %v790_v48 = vpop.permute.xlu0 %789 }
 0x204   : > { %v1036_v9 = vpop.permute.xlu1 %1035 }
 0x206   : > { %v802_v0 = vpop.permute.xlu0 %801 }
 0x207   : > { %v813_v13 = vadd.f32 %v802_v0, %v2188_v18  ;;  %v511_v0 = vadd.f32 %v2295_v63, %v2503_v17  ;;  %v756_v17 = vadd.f32 %v2536_v7, %v2460_v10 }
 0x208   : > { %v2591_v49 = vpop.permute.xlu1 %987 }
 0x20a   : > { %v806_v60 = vpop.permute.xlu0 %805 }
 0x20b   : > { %v815_v61 = vadd.f32 %v806_v60, %v2200_v20 }
 0x20c   : > { %v2594_v14 = vpop.permute.xlu1 %991 }
 0x20d   : > { %829 = vperm.xlu1 %1764, %v815_v61   ;;  %v3381_v61 = vmov 0   ;;  %v1000_v7 = vadd.f32 %v2594_v14, %v2488_v4  ;;  %v3383_v4 = vld [vmem:[#allocation30_spill] sm:$0xff] }
 0x20e   : > { %v1050_v34 = vpop.permute.xlu0 %1049  ;;  %v753_v14 = vadd.f32 %v3383_v4, %v2509_v31 }
 0x20f   : > { %v1059_v6 = vadd.f32 %v1050_v34, %v2224_v24 }
 0x210   : > { %v2597_v27 = vpop.permute.xlu1 %277 }
 0x211   : > { %1063 = vperm.xlu1 %1764, %v1057_v52  }
 0x212   : > { %v1030_v54 = vpop.permute.xlu0 %1029 }
 0x213   : > { %v1041_v8 = vadd.f32 %v1030_v54, %v2212_v22  ;;  %v327_v22 = vadd.f32 %v2266_v45, %v2110_v1  ;;  %v799_v54 = vadd.f32 %v790_v48, %v2200_v20  ;;  %v569_v20 = vadd.f32 %v2303_v28, %v2150_v11 }
 0x214   : > { %v2601_v29 = vpop.permute.xlu1 %281  ;;  %v1044_v45 = vadd.f32 %v1036_v9, %v2228_v25  ;;  %v269_v11 = vadd.f32 %v2264_v39, %v2480_v57  ;;  %v816_v39 = vadd.f32 %v2578_v44, %v2204_v21  ;;  %v1060_v44 = vadd.f32 %v2587_v55, %v2228_v25 }
 0x215   : > { %1073 = vperm.xlu1 %1764, %v1059_v6   ;;  %1103 = vperm.xlu0 %1761, %v1041_v8   ;;  %v3382_v8 = vmov 15   ;;  %v270_v25 = vadd.f32 %v2262_v38, %v2431_v47 }
 0x216   : > { %v1034_v41 = vpop.permute.xlu0 %1033 }
 0x217   : > { %v1043_v60 = vadd.f32 %v1034_v41, %v2224_v24  ;;  %v330_v41 = vadd.f32 %v2268_v46, %v2116_v2  ;;  %v267_v46 = vadd.f32 %v2257_v36, %v2465_v30 }
 0x218   : > { %v2605_v40 = vpop.permute.xlu1 %519 }
 0x219   : > { %1765 = vset.pattern.permute.xlu1 %v3381_v61  ;;  %1113 = vperm.xlu0 %1761, %v1043_v60   ;;  %v572_v60 = vadd.f32 %v2307_v32, %v2157_v12  ;;  %v814_v12 = vadd.f32 %v2576_v51, %v2192_v19  ;;  %v509_v32 = vadd.f32 %v2286_v59, %v2493_v5 }
 0x21a   : > { %859 = vperm.xlu1 %1765, %v797_v15   ;;  %v2608_v52 = vpop.permute.xlu0 %985  ;;  %v1042_v15 = vadd.f32 %v1032_v42, %v2216_v23  ;;  %v1058_v51 = vadd.f32 %v2580_v37, %v2216_v23  ;;  %v754_v5 = vadd.f32 %v2526_v33, %v2452_v53 }
 0x21c   : > { %v2613_v34 = vpop.permute.xlu1 %523 }
 0x21d   : > { %1766 = vset.pattern.permute.xlu0 %v3382_v8 }
 0x21e   : > { %869 = vperm.xlu1 %1765, %v799_v54   ;;  %333 = vperm.xlu0 %1766, %v327_v22   ;;  %v2616_v24 = vpop.permute.xlu0 %989 }
 0x220   : > { %v764_v6 = vpop.permute.xlu1 %763 }
 0x221   : > { %v774_v63 = vadd.f32 %v764_v6, %v754_v5  ;;  %v3386_v6 = vld [vmem:[#allocation31_spill] sm:$0xff] }
 0x222   : > { %874 = vperm.xlu1 %1765, %v800_v50   ;;  %348 = vperm.xlu0 %1766, %v330_v41   ;;  %v276_v1 = vpop.permute.xlu0 %275  ;;  %v998_v41 = vadd.f32 %v2591_v49, %v2475_v56  ;;  %v512_v56 = vadd.f32 %v2293_v62, %v2446_v16  ;;  %v3384_v50 = vld [vmem:[#allocation13_spill] sm:$0xff]  ;;  %v3385_v16 = vld [vmem:[#allocation26_spill] sm:$0xff] }
 0x223   : > { %v287_v22 = vadd.f32 %v276_v1, %v267_v46  ;;  %v755_v1 = vadd.f32 %v3386_v6, %v3385_v16 }
 0x224   : > { %v768_v2 = vpop.permute.xlu1 %767 }
 0x225   : > { %v776_v53 = vadd.f32 %v768_v2, %v756_v17 }
 0x226   : > { %1108 = vperm.xlu1 %1765, %v1042_v15   ;;  %575 = vperm.xlu0 %1766, %v569_v20   ;;  %v280_v48 = vpop.permute.xlu0 %279 }
 0x227   : > { %v289_v36 = vadd.f32 %v280_v48, %v269_v11 }
 0x228   : > { %v1008_v28 = vpop.permute.xlu1 %1007 }
 0x22a   : > { %1118 = vperm.xlu1 %1765, %v1044_v45   ;;  %590 = vperm.xlu0 %1766, %v572_v60   ;;  %v518_v42 = vpop.permute.xlu0 %517  ;;  %v3387_v45 = vld [vmem:[#allocation11_spill] sm:$0xff] }
 0x22b   : > { %v529_v30 = vadd.f32 %v518_v42, %v509_v32  ;;  %v3388_v60 = vld [vmem:[#allocation27_spill] sm:$0xff]  ;;  %v3391_v32 = vld [vmem:[#allocation29_spill] sm:$0xff] }
 0x22c   : > { %v1012_v57 = vpop.permute.xlu1 %1011  ;;  %v997_v31 = vadd.f32 %v2608_v52, %v3388_v60 }
 0x22d   : > { %v1020_v47 = vadd.f32 %v1012_v57, %v1000_v7 }
 0x22e   : > { %819 = vperm.xlu0 %1766, %v813_v13   ;;  %355 = vrot.lane.b32.xlu1 %v287_v22, %s1915_s19  ;;  %v522_v9 = vpop.permute.xlu0 %521  ;;  %v3389_v22 = vld [vmem:[#allocation28_spill] sm:$0xff] }
 0x22f   : > { %1767 = vset.pattern.permute.xlu1 %v3382_v8  ;;  %v531_v59 = vadd.f32 %v522_v9, %v511_v0  ;;  %v268_v8 = vadd.f32 %v2255_v35, %v2422_v43  ;;  %v290_v35 = vadd.f32 %v2601_v29, %v270_v25  ;;  %v1018_v43 = vadd.f32 %v1008_v28, %v998_v41  ;;  %v3390_v28 = vld [vmem:[#allocation12_spill] sm:$0xff] }
 0x230   : > { %v1292_v54 = vpop.permute.xlu1 %1291  ;;  %v999_v11 = vadd.f32 %v2616_v24, %v3389_v22  ;;  %v3392_v24 = vld [vmem:[#allocation32_spill] sm:$0xff] }
 0x231   : > { %v288_v37 = vadd.f32 %v2597_v27, %v268_v8  ;;  %v510_v27 = vadd.f32 %v2284_v58, %v2438_v3  ;;  %v1302_v29 = vadd.f32 %v1292_v54, %v2236_v26  ;;  %v532_v58 = vadd.f32 %v2613_v34, %v512_v56  ;;  %v3394_v8 = vld [vmem:[#allocation34_spill] sm:$0xff] }
 0x232   : > { %824 = vperm.xlu0 %1766, %v814_v12   ;;  %359 = vrot.lane.b32.xlu1 %v289_v36, %s1915_s19  ;;  %v762_v18 = vpop.permute.xlu0 %761 }
 0x233   : > { %v530_v38 = vadd.f32 %v2605_v40, %v510_v27  ;;  %v773_v40 = vadd.f32 %v762_v18, %v753_v14 }
 0x234   : > { %v1296_v33 = vpop.permute.xlu1 %1295 }
 0x235   : > { %v1304_v57 = vadd.f32 %v1296_v33, %v3390_v28 }
 0x236   : > { %834 = vperm.xlu0 %1766, %v816_v39   ;;  %597 = vrot.lane.b32.xlu1 %v529_v30, %s1915_s19  ;;  %v766_v19 = vpop.permute.xlu0 %765 }
 0x237   : > { %v775_v48 = vadd.f32 %v766_v19, %v755_v1 }
 0x238   : > { %v1276_v55 = vpop.permute.xlu1 %1275 }
 0x239   : > { %v1286_v5 = vadd.f32 %v1276_v55, %v2236_v26 }
 0x23a   : > { %1068 = vperm.xlu0 %1766, %v1058_v51   ;;  %601 = vrot.lane.b32.xlu1 %v531_v59, %s1915_s19  ;;  %v1006_v21 = vpop.permute.xlu0 %1005 }
 0x23b   : > { %v1017_v42 = vadd.f32 %v1006_v21, %v997_v31  ;;  %v3393_v21 = vld [vmem:[#allocation33_spill] sm:$0xff] }
 0x23c   : > { %v1280_v3 = vpop.permute.xlu1 %1279 }
 0x23d   : > { %v1288_v9 = vadd.f32 %v1280_v3, %v3390_v28 }
 0x23e   : > { %1078 = vperm.xlu0 %1766, %v1060_v44   ;;  %843 = vrot.lane.b32.xlu1 %v774_v63, %s1915_s19  ;;  %v1010_v23 = vpop.permute.xlu0 %1009 }
 0x23f   : > { %v1019_v12 = vadd.f32 %v1010_v23, %v999_v11  ;;  %v3399_v11 = vld [vmem:[#allocation21_spill] sm:$0xff] }
 0x240   : > { %v1232_v20 = vpop.permute.xlu1 %1231 }
 0x241   : > { %v1242_v18 = vadd.f32 %v1232_v20, %v3391_v32 }
 0x242   : > { %357 = vrot.lane.b32.xlu0 %v288_v37, %s1915_s19  ;;  %847 = vrot.lane.b32.xlu1 %v776_v53, %s1915_s19  ;;  %v1290_v10 = vpop.permute.xlu0 %1289 }
 0x243   : > { %v1301_v39 = vadd.f32 %v1290_v10, %v3387_v45 }
 0x244   : > { %v1236_v13 = vpop.permute.xlu1 %1235 }
 0x245   : > { %v1244_v19 = vadd.f32 %v1236_v13, %v3392_v24  ;;  %v3398_v13 = vld [vmem:[#allocation22_spill] sm:$0xff] }
 0x246   : > { %361 = vrot.lane.b32.xlu0 %v290_v35, %s1915_s19  ;;  %1087 = vrot.lane.b32.xlu1 %v1018_v43, %s1915_s19  ;;  %v1294_v49 = vpop.permute.xlu0 %1293 }
 0x247   : > { %v1303_v15 = vadd.f32 %v1294_v49, %v3384_v50 }
 0x248   : > { %v1252_v52 = vpop.permute.xlu1 %1251 }
 0x249   : > { %v1262_v30 = vadd.f32 %v1252_v52, %v1242_v18 }
 0x24a   : > { %599 = vrot.lane.b32.xlu0 %v530_v38, %s1915_s19  ;;  %1091 = vrot.lane.b32.xlu1 %v1020_v47, %s1915_s19  ;;  %v1274_v62 = vpop.permute.xlu0 %1273  ;;  %v215_v47 = vlaneseq }
 0x24b   : > { %v1285_v34 = vadd.f32 %v1274_v62, %v3387_v45  ;;  %v3396_v62 = vld [vmem:[#allocation16_spill] sm:$0xff]  ;;  %v3397_v45 = vld [vmem:[#allocation18_spill] sm:$0xff] }
 0x24c   : > { %v2729_v49 = vand.u32 127, %v215_v47 }
 0x24e   : > { %603 = vrot.lane.b32.xlu0 %v532_v58, %s1915_s19  ;;  %1312 = vperm.xlu1 %1767, %v1302_v29   ;;  %v1278_v2 = vpop.permute.xlu0 %1277  ;;  %vm221_vm1 = vcmp.eq.s32.totalorder %v2729_v49, 15  ;;  %vm220_vm2 = vcmp.eq.s32.totalorder %v2729_v49, 0 }
 0x24f   : > { %v1287_v46 = vadd.f32 %v1278_v2, %v3384_v50  ;;  %v2753_v2 = vshrl.u32 %v215_v47, 7 }
 0x251   : > { %v2772_v18 = vsub.s32 7, %v2753_v2  ;;  %v2784_v24 = vadd.s32 8, %v2753_v2  ;;  %vm399_vm3 = vcmp.lt.s32.totalorder %v2753_v2, 1  ;;  %vm412_vm4 = vcmp.lt.s32.totalorder %v2753_v2, 7 }
 0x252   : > { %841 = vrot.lane.b32.xlu0 %v773_v40, %s1915_s19  ;;  %1317 = vperm.xlu1 %1767, %v1303_v15   ;;  %v1230_v36 = vpop.permute.xlu0 %1229  ;;  %v3395_v15 = vld [vmem:[#allocation17_spill] sm:$0xff]  ;;  %vm222_vm6 = vcmp.eq.s32.totalorder %v2753_v2, 0 }
 0x253   : > { %v1241_v44 = vadd.f32 %v1230_v36, %v3393_v21  ;;  %v2769_v36 = vsub.s32 0, %v2753_v2  ;;  %vm225_vm5 = vcmp.eq.s32.totalorder %v2784_v24, 15 }
 0x254   : > { %v1256_v0 = vpop.permute.xlu1 %1255 }
 0x255   : > { %v1264_v59 = vadd.f32 %v1256_v0, %v1244_v19 }
 0x256   : > { %845 = vrot.lane.b32.xlu0 %v775_v48, %s1915_s19  ;;  %1768 = vset.pattern.permute.xlu1 %v3381_v61  ;;  %v1234_v51 = vpop.permute.xlu0 %1233 }
 0x257   : > { %1347 = vperm.xlu1 %1768, %v1285_v34   ;;  %v1243_v23 = vadd.f32 %v1234_v51, %v3394_v8 }
 0x25a   : > { %1085 = vrot.lane.b32.xlu0 %v1017_v42, %s1915_s19  ;;  %v1250_v54 = vpop.permute.xlu0 %1249 }
 0x25b   : > { %1357 = vperm.xlu1 %1768, %v1287_v46   ;;  %v1261_v63 = vadd.f32 %v1250_v54, %v1241_v44 }
 0x25e   : > { %1089 = vrot.lane.b32.xlu0 %v1019_v12, %s1915_s19 }
 0x25f   : > { %1362 = vperm.xlu1 %1768, %v1288_v9  }
 0x262   : > { %1307 = vperm.xlu0 %1766, %v1301_v39  }
 0x263   : > { %1331 = vrot.lane.b32.xlu1 %v1262_v30, %s1915_s19 }
 0x266   : > { %1322 = vperm.xlu0 %1766, %v1304_v57   ;;  %v3400_v57 = vld [vmem:[#allocation23_spill] sm:$0xff] }
 0x267   : > { %1335 = vrot.lane.b32.xlu1 %v1264_v59, %s1915_s19 }
 0x26a   : > { %1769 = vset.pattern.permute.xlu0 %v3381_v61 }
 0x26b   : > { %1352 = vperm.xlu0 %1769, %v1286_v5  }
 0x26e   : > { %v1254_v17 = vpop.permute.xlu0 %1253 }
 0x26f   : > { %1329 = vrot.lane.b32.xlu0 %v1261_v63, %s1915_s19  ;;  %v1263_v37 = vadd.f32 %v1254_v17, %v1243_v23  ;;  %v3401_v63 = vld [vmem:[#allocation14_spill] sm:$0xff] }
 0x273   : > { %1333 = vrot.lane.b32.xlu0 %v1263_v37, %s1915_s19 }
 0x27b   : > { %v865_v26 = vpop.permute.xlu0 %864 }
 0x288   : > { %v2707_v53 = vpop.permute.xlu1 %829 }
 0x28c   : > { %v2709_v33 = vpop.permute.xlu1 %1063 }
 0x290   : > { %v2711_v41 = vpop.permute.xlu1 %1073  ;;  %v2713_v61 = vpop.permute.xlu0 %1103 }
 0x294   : > { %v2715_v25 = vpop.permute.xlu0 %1113 }
 0x295   : > { %v2717_v35 = vpop.permute.xlu1 %859 }
 0x299   : > { %v2719_v43 = vpop.permute.xlu1 %869  ;;  %v334_v10 = vpop.permute.xlu0 %333 }
 0x29d   : > { %v875_v7 = vpop.permute.xlu1 %874  ;;  %v2721_v27 = vpop.permute.xlu0 %348 }
 0x2a1   : > { %v2723_v55 = vpop.permute.xlu1 %1108  ;;  %v576_v38 = vpop.permute.xlu0 %575 }
 0x2a5   : > { %v2725_v56 = vpop.permute.xlu1 %1118  ;;  %v2727_v29 = vpop.permute.xlu0 %590 }
 0x2a9   : > { %v356_v58 = vpop.permute.xlu1 %355  ;;  %v2731_v3 = vpop.permute.xlu0 %819 }
 0x2aa   : > { %v367_v50 = vsel %vm221_vm1, %v334_v10, %v356_v58 }
 0x2ab   : > { %v2740_v40 = vsel %vm220_vm2, %v3395_v15, %v367_v50 }
 0x2ac   : > { %v421_v20 = vmul.f32 2.0, %v2740_v40  ;;  %v395_v19 = vrot.slane %v2740_v40, 7  ;;  %v408_v54 = vrot.slane %v2740_v40, 1 }
 0x2ad   : > { %v360_v4 = vpop.permute.xlu1 %359  ;;  %v825_v14 = vpop.permute.xlu0 %824 }
 0x2ae   : > { %v369_v16 = vsel %vm221_vm1, %v3396_v62, %v360_v4  ;;  %v425_v42 = vrot.slane %v421_v20, 1 }
 0x2af   : > { %v2749_v34 = vsel %vm220_vm2, %v3397_v45, %v369_v16 }
 0x2b0   : > { %v422_v46 = vmul.f32 2.0, %v2749_v34  ;;  %v2775_v39 = vadd.f32 %v425_v42, %v2740_v40  ;;  %v396_v21 = vrot.slane %v2749_v34, 7  ;;  %v409_v47 = vrot.slane %v2749_v34, 1 }
 0x2b1   : > { %v598_v6 = vpop.permute.xlu1 %597  ;;  %v835_v1 = vpop.permute.xlu0 %834 }
 0x2b2   : > { %v609_v31 = vsel %vm221_vm1, %v576_v38, %v598_v6  ;;  %v426_v32 = vrot.slane %v422_v46, 1  ;;  %v456_v38 = vrot.slane %v2775_v39, %v2769_v36 }
 0x2b3   : > { %v2759_v22 = vsel %vm220_vm2, %v3398_v13, %v609_v31 }
 0x2b4   : > { %v661_v30 = vmul.f32 2.0, %v2759_v22  ;;  %v2801_v8 = vadd.f32 %v426_v32, %v2749_v34  ;;  %v649_v6 = vrot.slane %v2759_v22, 1  ;;  %v3403_v32 = vld [vmem:[#allocation19_spill] sm:$0xff] }
 0x2b5   : > { %v602_v48 = vpop.permute.xlu1 %601  ;;  %v1069_v60 = vpop.permute.xlu0 %1068 }
 0x2b6   : > { %v611_v28 = vsel %vm221_vm1, %v3399_v11, %v602_v48  ;;  %v665_v58 = vrot.slane %v661_v30, 1  ;;  %v460_v48 = vrot.slane %v2801_v8, %v2769_v36 }
 0x2b7   : > { %v2781_v0 = vsel %vm220_vm2, %v3400_v57, %v611_v28 }
 0x2b8   : > { %v662_v23 = vmul.f32 2.0, %v2781_v0  ;;  %v2832_v13 = vadd.f32 %v665_v58, %v2759_v22  ;;  %v638_v57 = vrot.slane %v2781_v0, 7 }
 0x2b9   : > { %v844_v9 = vpop.permute.xlu1 %843  ;;  %v2764_v12 = vpop.permute.xlu0 %1078 }
 0x2ba   : > { %v854_v52 = vsel %vm221_vm1, %v825_v14, %v844_v9  ;;  %v637_v14 = vrot.slane %v2759_v22, 7  ;;  %v666_v31 = vrot.slane %v662_v23, 1 }
 0x2bb   : > { %v2789_v51 = vsel %vm220_vm2, %v865_v26, %v854_v52  ;;  %v3402_v26 = vld [vmem:[#allocation15_spill] sm:$0xff] }
 0x2bc   : > { %v915_v4 = vmul.f32 2.0, %v2789_v51 }
 0x2bd   : > { %v848_v59 = vpop.permute.xlu1 %847  ;;  %v358_v5 = vpop.permute.xlu0 %357 }
 0x2be   : > { %v856_v44 = vsel %vm221_vm1, %v835_v1, %v848_v59  ;;  %v368_v17 = vsel %vm221_vm1, %v3401_v63, %v358_v5  ;;  %v919_v11 = vrot.slane %v915_v4, 7 }
 0x2bf   : > { %v2806_v37 = vsel %vm220_vm2, %v875_v7, %v856_v44  ;;  %v392_v10 = vsel %vm220_vm2, %v3402_v26, %v368_v17  ;;  %v696_v17 = vrot.slane %v2832_v13, %v2769_v36 }
 0x2c0   : > { %v916_v50 = vmul.f32 2.0, %v2806_v37  ;;  %v397_v7 = vrot.slane %v392_v10, 7  ;;  %v431_v15 = vmul.f32 2.0, %v392_v10  ;;  %v410_v1 = vrot.slane %v392_v10, 1 }
 0x2c1   : > { %v1088_v62 = vpop.permute.xlu1 %1087  ;;  %v362_v16 = vpop.permute.xlu0 %361  ;;  %v2854_v23 = vadd.f32 %v919_v11, %v2789_v51 }
 0x2c2   : > { %v1098_v20 = vsel %vm221_vm1, %v1069_v60, %v1088_v62  ;;  %v370_v45 = vsel %vm221_vm1, %v2721_v27, %v362_v16  ;;  %v400_v46 = vsel %vm399_vm3, %v395_v19, %v397_v7  ;;  %v402_v42 = vsel %vm399_vm3, %v397_v7, %v395_v19 }
 0x2c3   : > { %v405_v28 = vadd.f32 %v400_v46, %v392_v10  ;;  %v435_v60 = vrot.slane %v431_v15, 7  ;;  %v920_v9 = vrot.slane %v916_v50, 7  ;;  %v404_v52 = vadd.f32 %v402_v42, %v2740_v40 }
 0x2c4   : > { %v2838_v27 = vsel %vm220_vm2, %v2723_v55, %v1098_v20  ;;  %v394_v39 = vsel %vm220_vm2, %v3403_v32, %v370_v45  ;;  %v650_v19 = vrot.slane %v2781_v0, 1  ;;  %v415_v59 = vsel %vm412_vm4, %v410_v1, %v408_v54 }
 0x2c5   : > { %v600_v30 = vpop.permute.xlu0 %599  ;;  %v439_v5 = vadd.f32 %v435_v60, %v392_v10  ;;  %v2848_v40 = vadd.f32 %v666_v31, %v2781_v0  ;;  %v418_v44 = vadd.f32 %v415_v59, %v405_v28  ;;  %v1159_v55 = vmul.f32 2.0, %v2838_v27  ;;  %v1092_v4 = vpop.permute.xlu1 %1091 }
 0x2c6   : > { %v398_v63 = vrot.slane %v394_v39, 7  ;;  %v413_v26 = vsel %vm412_vm4, %v408_v54, %v410_v1  ;;  %v883_v10 = vrot.slane %v2789_v51, 7  ;;  %v2861_v50 = vadd.f32 %v920_v9, %v2806_v37  ;;  %v3404_v9 = vld [vmem:[#allocation20_spill] sm:$0xff] }
 0x2c7   : > { %v444_v58 = vrot.slane %v439_v5, %v2772_v18  ;;  %v417_v7 = vadd.f32 %v413_v26, %v404_v52  ;;  %v895_v16 = vrot.slane %v2789_v51, 1  ;;  %v1163_v20 = vrot.slane %v1159_v55, 7 }
 0x2c8   : > { %v403_v15 = vsel %vm399_vm3, %v398_v63, %v396_v21  ;;  %v401_v45 = vsel %vm399_vm3, %v396_v21, %v398_v63  ;;  %v411_v54 = vrot.slane %v394_v39, 1  ;;  %v700_v1 = vrot.slane %v2848_v40, %v2769_v36 }
 0x2c9   : > { %v604_v62 = vpop.permute.xlu0 %603  ;;  %v450_v31 = vsel %vm225_vm5, %v444_v58, %v418_v44  ;;  %v406_v46 = vadd.f32 %v403_v15, %v2749_v34  ;;  %v432_v42 = vmul.f32 2.0, %v394_v39  ;;  %v928_v11 = vrot.slane %v2854_v23, %v2772_v18  ;;  %v3405_v15 = vld [vmem:[#allocation25_spill] sm:$0xff] }
 0x2ca   : > { %v884_v28 = vrot.slane %v2806_v37, 7  ;;  %v896_v60 = vrot.slane %v2806_v37, 1  ;;  %v610_v21 = vsel %vm221_vm1, %v3404_v9, %v600_v30  ;;  %v461_v32 = vsel %vm222_vm6, %v456_v38, %v417_v7  ;;  %v2898_v38 = vpop.permute.xlu1 %1312 }
 0x2cb   : > { %v1127_v59 = vrot.slane %v2838_v27, 7  ;;  %v407_v5 = vadd.f32 %v401_v45, %v394_v39  ;;  %v2885_v55 = vmul.f32 0.11111111, %v450_v31  ;;  %v2888_v63 = vadd.f32 %v1163_v20, %v2838_v27 }
 0x2cc   : > { %v414_v30 = vsel %vm412_vm4, %v409_v47, %v411_v54  ;;  %v416_v26 = vsel %vm412_vm4, %v411_v54, %v409_v47  ;;  %v436_v7 = vrot.slane %v432_v42, 7  ;;  %v634_v45 = vsel %vm220_vm2, %v3405_v15, %v610_v21  ;;  %v3406_v42 = vld [vmem:[#allocation24_spill] sm:$0xff] }
 0x2cd   : > { %v842_v44 = vpop.permute.xlu0 %841  ;;  %v419_v58 = vadd.f32 %v414_v30, %v406_v46  ;;  %v612_v20 = vsel %vm221_vm1, %v2727_v29, %v604_v62  ;;  %v1100_v31 = vsel %vm221_vm1, %v2764_v12, %v1092_v4  ;;  %v639_v34 = vrot.slane %v634_v45, 7 }
 0x2ce   : > { %v651_v9 = vrot.slane %v634_v45, 1  ;;  %v671_v52 = vmul.f32 2.0, %v634_v45  ;;  %v2909_v47 = vmul.f32 0.11111111, %v461_v32  ;;  %v420_v46 = vadd.f32 %v416_v26, %v407_v5 }
 0x2cf   : > { %v636_v21 = vsel %vm220_vm2, %v3406_v42, %v612_v20  ;;  %v2917_v30 = vmul.f32 %v2885_v55, %v2885_v55  ;;  %v641_v12 = vsel %vm399_vm3, %v637_v14, %v639_v34  ;;  %v643_v4 = vsel %vm399_vm3, %v639_v34, %v637_v14 }
 0x2d0   : > { %v440_v62 = vadd.f32 %v436_v7, %v394_v39  ;;  %v2932_v32 = vsel %vm220_vm2, %v2725_v56, %v1100_v31  ;;  %v646_v5 = vadd.f32 %v641_v12, %v634_v45  ;;  %v853_v26 = vsel %vm221_vm1, %v2731_v3, %v842_v44  ;;  %v2946_v7 = vpop.permute.xlu1 %1317 }
 0x2d1   : > { %v846_v15 = vpop.permute.xlu0 %845  ;;  %v463_v20 = vsel %vm222_vm6, %v460_v48, %v419_v58  ;;  %v655_v14 = vsel %vm412_vm4, %v651_v9, %v649_v6  ;;  %v675_v39 = vrot.slane %v671_v52, 7  ;;  %v640_v56 = vrot.slane %v636_v21, 7 }
 0x2d2   : > { %v645_v31 = vadd.f32 %v643_v4, %v2759_v22  ;;  %v658_v34 = vadd.f32 %v655_v14, %v646_v5  ;;  %v652_v3 = vrot.slane %v636_v21, 1  ;;  %v672_v44 = vmul.f32 2.0, %v636_v21 }
 0x2d3   : > { %v679_v42 = vadd.f32 %v675_v39, %v634_v45  ;;  %v642_v8 = vsel %vm399_vm3, %v638_v57, %v640_v56  ;;  %v644_v48 = vsel %vm399_vm3, %v640_v56, %v638_v57  ;;  %v877_v52 = vsel %vm220_vm2, %v2717_v35, %v853_v26 }
 0x2d4   : > { %v448_v58 = vrot.slane %v440_v62, %v2772_v18  ;;  %v1160_v45 = vmul.f32 2.0, %v2932_v32  ;;  %v648_v4 = vadd.f32 %v642_v8, %v636_v21  ;;  %v653_v5 = vsel %vm412_vm4, %v649_v6, %v651_v9  ;;  %v2975_v9 = vpop.permute.xlu1 %1347 }
 0x2d5   : > { %v684_v14 = vrot.slane %v679_v42, %v2772_v18  ;;  %v656_v57 = vsel %vm412_vm4, %v652_v3, %v650_v19  ;;  %v676_v35 = vrot.slane %v672_v44, 7  ;;  %v657_v26 = vadd.f32 %v653_v5, %v645_v31  ;;  %v1086_v12 = vpop.permute.xlu0 %1085 }
 0x2d6   : > { %v647_v62 = vadd.f32 %v644_v48, %v2781_v0  ;;  %v660_v39 = vadd.f32 %v656_v57, %v648_v4  ;;  %v881_v56 = vrot.slane %v877_v52, 7  ;;  %v893_v29 = vrot.slane %v877_v52, 1 }
 0x2d7   : > { %v690_v22 = vsel %vm225_vm5, %v684_v14, %v658_v34  ;;  %v680_v8 = vadd.f32 %v676_v35, %v636_v21  ;;  %v905_v6 = vmul.f32 2.0, %v877_v52  ;;  %v1140_v42 = vrot.slane %v2932_v32, 1 }
 0x2d8   : > { %v706_v54 = vmul.f32 0.11111111, %v690_v22  ;;  %v885_v31 = vsel %vm399_vm3, %v881_v56, %v883_v10  ;;  %v887_v44 = vsel %vm399_vm3, %v883_v10, %v881_v56  ;;  %v1164_v48 = vrot.slane %v1160_v45, 7 }
 0x2d9   : > { %v654_v21 = vsel %vm412_vm4, %v650_v19, %v652_v3  ;;  %v688_v34 = vrot.slane %v680_v8, %v2772_v18  ;;  %v890_v4 = vadd.f32 %v885_v31, %v2789_v51  ;;  %v452_v5 = vsel %vm225_vm5, %v448_v58, %v420_v46  ;;  %v1090_v35 = vpop.permute.xlu0 %1089 }
 0x2da   : > { %v701_v14 = vsel %vm222_vm6, %v696_v17, %v657_v26  ;;  %v659_v10 = vadd.f32 %v654_v21, %v647_v62  ;;  %v889_v45 = vadd.f32 %v887_v44, %v877_v52  ;;  %v2999_v57 = vmul.f32 %v706_v54, %v706_v54 }
 0x2db   : > { %v692_v0 = vsel %vm225_vm5, %v688_v34, %v660_v39  ;;  %v899_v19 = vsel %vm412_vm4, %v895_v16, %v893_v29  ;;  %v909_v3 = vrot.slane %v905_v6, 1  ;;  %v3007_v46 = vmul.f32 0.11111111, %v463_v20  ;;  %v3022_v20 = vpop.permute.xlu1 %1357 }
 0x2dc   : > { %v3009_v58 = vmul.f32 0.11111111, %v692_v0  ;;  %v902_v13 = vadd.f32 %v899_v19, %v890_v4  ;;  %v855_v17 = vsel %vm221_vm1, %v2707_v53, %v846_v15  ;;  %v3014_v26 = vmul.f32 0.11111111, %v452_v5 }
 0x2dd   : > { %v3017_v62 = vadd.f32 %v1164_v48, %v2932_v32  ;;  %v913_v39 = vadd.f32 %v909_v3, %v877_v52  ;;  %v879_v56 = vsel %vm220_vm2, %v2719_v43, %v855_v17  ;;  %v3024_v22 = vmul.f32 0.11111111, %v701_v14  ;;  %v3078_v5 = vpop.permute.xlu0 %1307 }
 0x2de   : > { %v703_v53 = vsel %vm222_vm6, %v700_v1, %v659_v10  ;;  %v3033_v15 = vmul.f32 %v2909_v47, %v2909_v47  ;;  %v897_v52 = vsel %vm412_vm4, %v893_v29, %v895_v16  ;;  %v1486_v43 = vadd.f32 %v2999_v57, %v2917_v30 }
 0x2df   : > { %v3043_v8 = vmul.f32 %v3009_v58, %v3009_v58  ;;  %v901_v40 = vadd.f32 %v897_v52, %v889_v45  ;;  %v882_v6 = vrot.slane %v879_v56, 7  ;;  %v934_v1 = vsel %vm225_vm5, %v928_v11, %v902_v13  ;;  %v3085_v45 = vpop.permute.xlu1 %1362 }
 0x2e0   : > { %v940_v51 = vrot.slane %v913_v39, %v2769_v36  ;;  %v894_v31 = vrot.slane %v879_v56, 1  ;;  %v906_v44 = vmul.f32 2.0, %v879_v56  ;;  %v3053_v16 = vmul.f32 %v3014_v26, %v3014_v26 }
 0x2e1   : > { %v1176_v29 = vrot.slane %v3017_v62, %v2772_v18  ;;  %v3059_v48 = vmul.f32 %v3007_v46, %v3007_v46  ;;  %v886_v23 = vsel %vm399_vm3, %v882_v6, %v884_v28  ;;  %v3066_v11 = vmul.f32 %v706_v54, %v2885_v55 }
 0x2e2   : > { %v3068_v21 = vmul.f32 0.11111111, %v703_v53  ;;  %v888_v34 = vsel %vm399_vm3, %v884_v28, %v882_v6  ;;  %v3076_v4 = vmul.f32 %v3024_v22, %v3024_v22  ;;  %v1488_v14 = vadd.f32 %v3043_v8, %v3053_v16 }
 0x2e3   : > { %v3082_v10 = vmul.f32 0.11111111, %v934_v1  ;;  %v892_v55 = vadd.f32 %v886_v23, %v2806_v37  ;;  %v910_v54 = vrot.slane %v906_v44, 1  ;;  %v3087_v0 = vadd.f32 0.0001, %v1486_v43  ;;  %v1332_v23 = vpop.permute.xlu1 %1331 }
 0x2e4   : > { %v945_v28 = vsel %vm222_vm6, %v940_v51, %v901_v40  ;;  %v900_v19 = vsel %vm412_vm4, %v896_v60, %v894_v31  ;;  %v1097_v3 = vsel %vm221_vm1, %v2709_v33, %v1086_v12  ;;  %v891_v13 = vadd.f32 %v888_v34, %v879_v56 }
 0x2e5   : > { %v904_v17 = vadd.f32 %v900_v19, %v892_v55  ;;  %v914_v39 = vadd.f32 %v910_v54, %v879_v56  ;;  %v1121_v53 = vsel %vm220_vm2, %v2713_v61, %v1097_v3  ;;  %v1099_v40 = vsel %vm221_vm1, %v2711_v41, %v1090_v35 }
 0x2e6   : > { %v1125_v52 = vrot.slane %v1121_v53, 7  ;;  %v1137_v43 = vrot.slane %v1121_v53, 1  ;;  %v1149_v6 = vmul.f32 2.0, %v1121_v53  ;;  %v3104_v1 = vadd.f32 0.0001, %v1488_v14 }
 0x2e7   : > { %v1454_v51 = vsub.f32 %v3082_v10, %v2917_v30  ;;  %v898_v33 = vsel %vm412_vm4, %v894_v31, %v896_v60  ;;  %v1485_v61 = vadd.f32 %v3076_v4, %v3033_v15  ;;  %v3124_v30 = vmul.f32 %v3068_v21, %v3068_v21  ;;  %v1323_v60 = vpop.permute.xlu0 %1322 }
 0x2e8   : > { %v1129_v12 = vsel %vm399_vm3, %v1125_v52, %v1127_v59  ;;  %v1131_v41 = vsel %vm399_vm3, %v1127_v59, %v1125_v52  ;;  %v1123_v37 = vsel %vm220_vm2, %v2715_v25, %v1099_v40  ;;  %v949_v35 = vmul.f32 0.11111111, %v945_v28 }
 0x2e9   : > { %v903_v56 = vadd.f32 %v898_v33, %v891_v13  ;;  %v1133_v31 = vadd.f32 %v1131_v41, %v1121_v53  ;;  %v1134_v44 = vadd.f32 %v1129_v12, %v2838_v27  ;;  %v3407_v34 = vrot.slane %v2861_v50, %v2772_v18 }
 0x2ea   : > { %v944_v14 = vrot.slane %v914_v39, %v2769_v36  ;;  %v3408_v10 = vrot.slane %v2838_v27, 1  ;;  %v1153_v55 = vrot.slane %v1149_v6, 1  ;;  %v1126_v3 = vrot.slane %v1123_v37, 7 }
 0x2eb   : > { %v936_v59 = vsel %vm225_vm5, %v3407_v34, %v904_v17  ;;  %v1138_v13 = vrot.slane %v1123_v37, 1  ;;  %v1487_v17 = vadd.f32 %v3124_v30, %v3059_v48  ;;  %v1150_v39 = vmul.f32 2.0, %v1123_v37 }
 0x2ec   : > { %v1143_v25 = vsel %vm412_vm4, %v3408_v10, %v1137_v43  ;;  %v3409_v54 = vmov %v3408_v10  ;;  %v1157_v52 = vadd.f32 %v1153_v55, %v1121_v53  ;;  %v952_v40 = vmul.f32 0.11111111, %v936_v59 }
 0x2ed   : > { %v1141_v28 = vsel %vm412_vm4, %v1137_v43, %v3409_v54  ;;  %v1146_v19 = vadd.f32 %v1143_v25, %v1134_v44  ;;  %v3410_v33 = vrot.slane %v2888_v63, %v2772_v18  ;;  %v3411_v27 = vrot.slane %v2932_v32, 7  ;;  %v1353_v63 = vpop.permute.xlu0 %1352  ;;  %v1336_v54 = vpop.permute.xlu1 %1335 }
 0x2ee   : > { %v1145_v50 = vadd.f32 %v1141_v28, %v1133_v31  ;;  %v1184_v41 = vrot.slane %v1157_v52, %v2769_v36  ;;  %v947_v59 = vsel %vm222_vm6, %v944_v14, %v903_v56  ;;  %v1144_v10 = vsel %vm412_vm4, %v1140_v42, %v1138_v13 }
 0x2ef   : > { %v1178_v6 = vsel %vm225_vm5, %v3410_v33, %v1146_v19  ;;  %v1130_v43 = vsel %vm399_vm3, %v1126_v3, %v3411_v27  ;;  %v3412_v12 = vmov %v3411_v27  ;;  %v1154_v25 = vrot.slane %v1150_v39, 1 }
 0x2f0   : > { %v1132_v53 = vsel %vm399_vm3, %v3412_v12, %v1126_v3  ;;  %v1194_v31 = vmul.f32 0.11111111, %v1178_v6  ;;  %v1136_v34 = vadd.f32 %v1130_v43, %v2932_v32  ;;  %v1342_v55 = vsel %vm221_vm1, %v2898_v38, %v1332_v23 }
 0x2f1   : > { %v1135_v44 = vadd.f32 %v1132_v53, %v1123_v37  ;;  %v1189_v28 = vsel %vm222_vm6, %v1184_v41, %v1145_v50  ;;  %v1142_v56 = vsel %vm412_vm4, %v1138_v13, %v1140_v42  ;;  %v1158_v33 = vadd.f32 %v1154_v25, %v1123_v37  ;;  %v1330_v12 = vpop.permute.xlu0 %1329 }
 0x2f2   : > { %v1458_v19 = vsub.f32 %v1194_v31, %v2999_v57  ;;  %v1148_v14 = vadd.f32 %v1144_v10, %v1136_v34  ;;  %v1193_v3 = vmul.f32 0.11111111, %v1189_v28  ;;  %v1366_v39 = vsel %vm220_vm2, %v1353_v63, %v1342_v55 }
 0x2f3   : > { %v1147_v52 = vadd.f32 %v1142_v56, %v1135_v44  ;;  %v951_v6 = vmul.f32 0.11111111, %v947_v59  ;;  %v1344_v32 = vsel %vm221_vm1, %v1323_v60, %v1336_v54  ;;  %v1453_v42 = vsub.f32 %v949_v35, %v3033_v15 }
 0x2f4   : > { %v1494_v38 = vadd.f32 %v1458_v19, %v1454_v51  ;;  %v1180_v57 = vsel %vm225_vm5, %v1176_v29, %v1148_v14  ;;  %v1457_v23 = vsub.f32 %v1193_v3, %v3076_v4  ;;  %v1188_v37 = vrot.slane %v1158_v33, %v2769_v36 }
 0x2f5   : > { %v1196_v13 = vmul.f32 0.11111111, %v1180_v57  ;;  %v1456_v50 = vsub.f32 %v952_v40, %v3053_v16  ;;  %v1489_v27 = vadd.f32 0.0001, %v1485_v61  ;;  %v1403_v43 = vmul.f32 2.0, %v1366_v39  ;;  %v1334_v54 = vpop.permute.xlu0 %1333 }
 0x2f6   : > { %v1498_v51 = vadd.f32 0.0009, %v1494_v38  ;;  %v1493_v62 = vadd.f32 %v1457_v23, %v1453_v42  ;;  %v1191_v29 = vsel %vm222_vm6, %v1188_v37, %v1147_v52  ;;  %v3196_v15 = vsel %vm220_vm2, %v3085_v45, %v1344_v32 }
 0x2f7   : > { %v1460_v53 = vsub.f32 %v1196_v13, %v3043_v8  ;;  %v1455_v4 = vsub.f32 %v951_v6, %v3059_v48  ;;  %v1491_v16 = vadd.f32 0.0001, %v1487_v17  ;;  %v1195_v61 = vmul.f32 0.11111111, %v1191_v29 }
 0x2f8   : > { %v3200_v60 = vmul.f32 %v1498_v51, %v3087_v0  ;;  %v1497_v35 = vadd.f32 0.0009, %v1493_v62  ;;  %v1407_v41 = vrot.slane %v1403_v43, 7  ;;  %v1341_v31 = vsel %vm221_vm1, %v3078_v5, %v1330_v12 }
 0x2f9   : > { %v1496_v40 = vadd.f32 %v1460_v53, %v1456_v50  ;;  %v1459_v8 = vsub.f32 %v1195_v61, %v3124_v30  ;;  %v1372_v45 = vrot.slane %v3196_v15, 7  ;;  %v1371_v44 = vrot.slane %v1366_v39, 7 }
 0x2fa   : > { %1770 = vrcp.f32 %v3200_v60  ;;  %v3208_v48 = vmul.f32 %v1497_v35, %v1489_v27  ;;  %v1404_v17 = vmul.f32 2.0, %v3196_v15  ;;  %v1365_v34 = vsel %vm220_vm2, %v2975_v9, %v1341_v31 }
 0x2fb   : > { %v1500_v0 = vadd.f32 0.0009, %v1496_v40  ;;  %v1495_v63 = vadd.f32 %v1459_v8, %v1455_v4  ;;  %v1384_v59 = vrot.slane %v3196_v15, 1  ;;  %v1369_v5 = vrot.slane %v1365_v34, 7 }
 0x2fc   : > { %v1381_v10 = vrot.slane %v1365_v34, 1  ;;  %1772 = vrcp.f32 %v3208_v48  ;;  %v1411_v25 = vadd.f32 %v1407_v41, %v1366_v39  ;;  %v1393_v55 = vmul.f32 2.0, %v1365_v34 }
 0x2fd   : > { %v3217_v30 = vmul.f32 %v1500_v0, %v3104_v1  ;;  %v1499_v28 = vadd.f32 0.0009, %v1495_v63  ;;  %v1383_v19 = vrot.slane %v1366_v39, 1  ;;  %v1373_v56 = vsel %vm399_vm3, %v1369_v5, %v1371_v44 }
 0x2fe   : > { %v1375_v9 = vsel %vm399_vm3, %v1371_v44, %v1369_v5  ;;  %v1408_v14 = vrot.slane %v1404_v17, 7  ;;  %v1378_v52 = vadd.f32 %v1373_v56, %v1366_v39  ;;  %v1397_v6 = vrot.slane %v1393_v55, 1 }
 0x2ff   : > { %1774 = vrcp.f32 %v3217_v30  ;;  %v1377_v3 = vadd.f32 %v1375_v9, %v1365_v34  ;;  %v3224_v33 = vmul.f32 %v1499_v28, %v1491_v16  ;;  %v1387_v1 = vsel %vm412_vm4, %v1383_v19, %v1381_v10 }
 0x300   : > { %v1343_v38 = vsel %vm221_vm1, %v2946_v7, %v1334_v54  ;;  %v1416_v57 = vrot.slane %v1411_v25, %v2772_v18  ;;  %v1385_v32 = vsel %vm412_vm4, %v1381_v10, %v1383_v19  ;;  %v1390_v42 = vadd.f32 %v1387_v1, %v1378_v52 }
 0x301   : > { %v1367_v39 = vsel %vm220_vm2, %v3022_v20, %v1343_v38  ;;  %1776 = vrcp.f32 %v3224_v33  ;;  %v1389_v23 = vadd.f32 %v1385_v32, %v1377_v3  ;;  %v1401_v37 = vadd.f32 %v1397_v6, %v1365_v34 }
 0x302   : > { %v1370_v13 = vrot.slane %v1367_v39, 7  ;;  %v1412_v50 = vadd.f32 %v1408_v14, %v3196_v15  ;;  %v1422_v7 = vsel %vm225_vm5, %v1416_v57, %v1390_v42  ;;  %v1382_v27 = vrot.slane %v1367_v39, 1 }
 0x303   : > { %v1394_v51 = vmul.f32 2.0, %v1367_v39  ;;  %v1428_v43 = vrot.slane %v1401_v37, %v2769_v36  ;;  %v1438_v12 = vmul.f32 0.11111111, %v1422_v7  ;;  %v1449_v20 = vmul.f32 %v3024_v22, %v2909_v47 }
 0x304   : > { %v1374_v62 = vsel %vm399_vm3, %v1370_v13, %v1372_v45  ;;  %v1376_v49 = vsel %vm399_vm3, %v1372_v45, %v1370_v13  ;;  %v1388_v61 = vsel %vm412_vm4, %v1384_v59, %v1382_v27  ;;  %v1420_v41 = vrot.slane %v1412_v50, %v2772_v18 }
 0x305   : > { %v1379_v29 = vadd.f32 %v1376_v49, %v1367_v39  ;;  %v1380_v53 = vadd.f32 %v1374_v62, %v3196_v15  ;;  %v1433_v4 = vsel %vm222_vm6, %v1428_v43, %v1389_v23  ;;  %v1462_v16 = vsub.f32 %v1438_v12, %v3066_v11 }
 0x306   : > { %v1398_v35 = vrot.slane %v1394_v51, 1  ;;  %v1437_v31 = vmul.f32 0.11111111, %v1433_v4  ;;  %v1386_v8 = vsel %vm412_vm4, %v1382_v27, %v1384_v59  ;;  %v1452_v44 = vmul.f32 %v3009_v58, %v3014_v26 }
 0x307   : > { %v1771_v40 = vpop.eup %1770  ;;  %v1392_v47 = vadd.f32 %v1388_v61, %v1380_v53  ;;  %v1391_v15 = vadd.f32 %v1386_v8, %v1379_v29  ;;  %v1474_v5 = vmul.f32 2.0, %v1462_v16  ;;  %v1466_v59 = vmul.f32 2.0, %v3066_v11 }
 0x308   : > { %v1510_v22 = vmul.f32 %v1771_v40, %v3200_v60  ;;  %v1402_v45 = vadd.f32 %v1398_v35, %v1367_v39  ;;  %v1461_v0 = vsub.f32 %v1437_v31, %v1449_v20  ;;  %v1451_v28 = vmul.f32 %v3068_v21, %v3007_v46 }
 0x309   : > { %v1424_v17 = vsel %vm225_vm5, %v1420_v41, %v1392_v47  ;;  %v1773_v34 = vpop.eup %1772  ;;  %v1465_v14 = vmul.f32 2.0, %v1449_v20  ;;  %v1478_v11 = vadd.f32 0.0009, %v1474_v5  ;;  %v1470_v57 = vadd.f32 0.0001, %v1466_v59 }
 0x30a   : > { %v1514_v63 = vsub.f32 2.0, %v1510_v22  ;;  %v1432_v18 = vrot.slane %v1402_v45, %v2769_v36  ;;  %v1440_v10 = vmul.f32 0.11111111, %v1424_v17  ;;  %v1509_v25 = vmul.f32 %v1773_v34, %v3208_v48 }
 0x30b   : > { %v1473_v56 = vmul.f32 2.0, %v1461_v0  ;;  %v1468_v21 = vmul.f32 2.0, %v1452_v44  ;;  %v1482_v13 = vmul.f32 %v1478_v11, %v1470_v57  ;;  %v1469_v7 = vadd.f32 0.0001, %v1465_v14 }
 0x30c   : > { %v1775_v55 = vpop.eup %1774  ;;  %v1518_v54 = vmul.f32 %v1771_v40, %v1514_v63  ;;  %v1435_v58 = vsel %vm222_vm6, %v1432_v18, %v1391_v15  ;;  %v1464_v24 = vsub.f32 %v1440_v10, %v1452_v44  ;;  %v1513_v26 = vsub.f32 2.0, %v1509_v25 }
 0x30d   : > { %v1512_v19 = vmul.f32 %v1775_v55, %v3217_v30  ;;  %v1439_v9 = vmul.f32 0.11111111, %v1435_v58  ;;  %v1477_v39 = vadd.f32 0.0009, %v1473_v56  ;;  %v1467_v62 = vmul.f32 2.0, %v1451_v28 }
 0x30e   : > { %v1522_v36 = vmul.f32 %v1518_v54, %v3200_v60  ;;  %v1777_v3 = vpop.eup %1776  ;;  %v1517_v52 = vmul.f32 %v1773_v34, %v1513_v26  ;;  %v1476_v38 = vmul.f32 2.0, %v1464_v24  ;;  %v1472_v49 = vadd.f32 0.0001, %v1468_v21 }
 0x30f   : > { %v1516_v1 = vsub.f32 2.0, %v1512_v19  ;;  %v1463_v6 = vsub.f32 %v1439_v9, %v1451_v28  ;;  %v1511_v46 = vmul.f32 %v1777_v3, %v3224_v33  ;;  %v1481_v29 = vmul.f32 %v1477_v39, %v1469_v7 }
 0x310   : > { %v1526_v2 = vsub.f32 2.0, %v1522_v36  ;;  %v1521_v32 = vmul.f32 %v1517_v52, %v3208_v48  ;;  %v1480_v51 = vadd.f32 0.0009, %v1476_v38 }
 0x311   : > { %v1520_v42 = vmul.f32 %v1775_v55, %v1516_v1  ;;  %v1515_v23 = vsub.f32 2.0, %v1511_v46  ;;  %v1475_v60 = vmul.f32 2.0, %v1463_v6 }
 0x312   : > { %v1530_v37 = vmul.f32 %v1526_v2, %v1518_v54  ;;  %v1525_v27 = vsub.f32 2.0, %v1521_v32  ;;  %v1484_v40 = vmul.f32 %v1480_v51, %v1472_v49 }
 0x313   : > { %v1524_v50 = vmul.f32 %v1520_v42, %v3217_v30  ;;  %v1519_v43 = vmul.f32 %v1777_v3, %v1515_v23  ;;  %v1479_v16 = vadd.f32 0.0009, %v1475_v60  ;;  %v1471_v30 = vadd.f32 0.0001, %v1467_v62 }
 0x314   : > { %v1534_v12 = vmul.f32 %v1530_v37, %v1482_v13  ;;  %v1529_v20 = vmul.f32 %v1525_v27, %v1517_v52 }
 0x315   : > { %v1528_v53 = vsub.f32 2.0, %v1524_v50  ;;  %v1523_v48 = vmul.f32 %v1519_v43, %v3224_v33  ;;  %v1483_v45 = vmul.f32 %v1479_v16, %v1471_v30 }
 0x316   : > { %v1538_v4 = vsub.f32 1.0, %v1534_v12  ;;  %v1533_v61 = vmul.f32 %v1529_v20, %v1481_v29 }
 0x317   : > { %v1532_v35 = vmul.f32 %v1528_v53, %v1520_v42  ;;  %v1527_v31 = vsub.f32 2.0, %v1523_v48 }
 0x318   : > { %v1542_v41 = vmul.f32 0.5, %v1538_v4  ;;  %v1537_v8 = vsub.f32 1.0, %v1533_v61 }
 0x319   : > { %v1536_v47 = vmul.f32 %v1532_v35, %v1484_v40  ;;  %v1531_v15 = vmul.f32 %v1527_v31, %v1519_v43 }
 0x31a   : > { %v1546_v22 = vmax.f32 %v1542_v41, 0.0  ;;  %v1541_v44 = vmul.f32 0.5, %v1537_v8 }
 0x31b   : > { %v1540_v0 = vsub.f32 1.0, %v1536_v47  ;;  %v1535_v33 = vmul.f32 %v1531_v15, %v1483_v45 }
 0x31c   : > { %v1550_v17 = vmin.f32 %v1546_v22, 1.0  ;;  %v1545_v34 = vmax.f32 %v1541_v44, 0.0 }
 0x31d   : > { %v1544_v63 = vmul.f32 0.5, %v1540_v0  ;;  %v1539_v5 = vsub.f32 1.0, %v1535_v33 }
 0x31e   : > { %1555 = vst.msk [vmem:[%s203_s24 + $0x8] sm:$0xff] %vm1553_vm7, %v1550_v17  ;;  %v1549_v18 = vmin.f32 %v1545_v34, 1.0 }
 0x31f   : > { %v1548_v10 = vmax.f32 %v1544_v63, 0.0  ;;  %v1543_v59 = vmul.f32 0.5, %v1539_v5 }
 0x320   : > { %1554 = vst.msk [vmem:[%s203_s24] sm:$0xff] %vm1553_vm7, %v1549_v18 }
 0x321   : > { %v1552_v25 = vmin.f32 %v1548_v10, 1.0  ;;  %v1547_v55 = vmax.f32 %v1543_v59, 0.0 }
 0x323   : > { %1557 = vst.msk [vmem:[%s203_s24 + $0x18] sm:$0xff] %vm1553_vm7, %v1552_v25  ;;  %v1551_v54 = vmin.f32 %v1547_v55, 1.0 }
 0x325   : > { %1556 = vst.msk [vmem:[%s203_s24 + $0x10] sm:$0xff] %vm1553_vm7, %v1551_v54 }
 0x326   : > { %1847 = shalt.err (!%p1844_p3)
}
 0x327   : > { %s1848_s29 = scalar_lea.hbm %s3283_s7, 512  ;;  %s1852_s20 = scalar_lea.hbm %s3330_s2, 2048 }
 0x328   : > { %p1849_p10 = scmp.ne.s32.totalorder %s3283_s7, %s1848_s29  ;;  %p1853_p5 = scmp.lt.s32.totalorder %s3283_s7, %s3330_s2 }
 0x329   : > { %p1854_p8 = scmp.lt.s32.totalorder %s1852_s20, %s1848_s29 }
 0x32a   : > { %p1850_p11 = pnand %p1849_p10, %p3413_p0 }
 0x32b   : > { %p1855_p6 = por %p1854_p8, %p1853_p5 }
 0x32c   : > { %p1851_p4 = pneg %p1850_p11 }
 0x32e   : > { %p1856_p12 = pnand %p1855_p6, %p1851_p4 }
 0x330   : > { %1859 = shalt.err (!%p1856_p12)
}
 0x331   : > { %s1917_s28 = smov 128   ;;  %s1918_s19 = smov 8  }
 0x332   : > { %1700 = dma.vmem_to_hbm [thread:$0]  (%p3413_p0), %s3285_s27, 512, %s3283_s7, %s1559_s13, %s1917_s28, %s1917_s28, %s1918_s19  }
 0x333 PF: > { %p1714_p2 = scmp.ge.s32.totalorder %s1902_s12, 2  ;;  %s1588_s24 = sand.u32 1, %s1890_s9  }
 0x334   : > { %p3414_p7 = scmp.ne.s32.totalorder %s3353_s22, 0  ;;  %s1589_s26 = scalar_lea.sflag [#allocation4], %s1588_s24 }
 0x336   : > { %p1710_p9 = pnand %p1714_p2, %p3414_p7 }
 0x338   : > { %p1711_p13 = pneg %p1710_p9 }
 0x33a   : > { %1885 = dma.done.wait (%p1711_p13), %s1589_s26, 512  }
 0x33b   : > { %1887 = vsyncadd (%p1711_p13), %s1589_s26, 4294966784  ;;  %p18_p1 = scmp.ge.s32.totalorder %s1959_s15, 6   ;;  %s3415_s9 = smov %s1894_s10 }
 0x33c   : > { %s3416_s10 = smov %s1898_s11  ;;  %s3417_s11 = smov %s1971_s18 }
 0x33d   : > { %s3418_s12 = smov %s1959_s15  ;;  %20 = sbr.rel (!%p18_p1) target bundleno = 7 (0x7), region = 86 }
 0x342   :  { %1594 = vsyncpa [#allocation3], 1 }
 0x343   :  { %1596 = vsyncpa [#allocation3 + $0x1], 1 }
 0x344   :  { %1597 = vsyncpa [#allocation6], 1 }
 0x345   :  { %1599 = vsyncpa [#allocation6 + $0x1], 1 }
 0x346   :  { %1600 = vsyncpa [#allocation4], 1 }
 0x347   :  { %1602 = vsyncpa [#allocation4 + $0x1], 1 }

</bundles_post_ra>
